<compile_context>
chip_gen: v7x
topology: tpu7x:2x2x1
jax: 0.10.0
libtpu: 0.0.40
codegen_flags: <defaults>
</compile_context>

<pallas_src>
import functools

import numpy as np

import jax
import jax.numpy as jnp
from jax.experimental import pallas as pl
from jax.experimental.pallas import tpu as pltpu


_TINY = 1e-37  # smallest "still > 0" kept score; guards corr = (mscore > 0) recovery


# ---------------------------------------------------------------------------
# Pallas kernel: masked (exp) score matrix; corr is implied by mscore > 0
# ---------------------------------------------------------------------------
def _fine_matching_kernel(score_ref, ref_mask_ref, src_mask_ref, gscore_ref,
                          mscore_ref, *,
                          k, mutual, confidence_threshold, use_global_score):
    # score_ref:    (bb, R, S) log-likelihood scores
    # ref_mask_ref: (bb, R, 1) f32 0/1 ref knn mask
    # src_mask_ref: (bb, 1, S) f32 0/1 src knn mask
    # gscore_ref:   (bb, 1, 1) f32 per-patch global score
    # mscore_ref:   (bb, R, S) f32 output: exp(score) * (global) * corr (>=_TINY where corr)
    raw = score_ref[...].astype(jnp.float32)
    s_exp = jnp.exp(raw)                       # one EUP pass over the slab

    def kth_largest(x, axis):
        """k-th largest value along `axis` (duplicates counted) == torch.topk k-th value.

        Each pass removes exactly one copy of the current maximum (ties broken
        by lowest index), so duplicated maxima cannot push the k-th value lower
        than the true one.
        """
        idx = jax.lax.broadcasted_iota(jnp.int32, x.shape, axis)
        big = jnp.int32(x.shape[axis])
        v = x
        for _ in range(k - 1):
            m = jnp.max(v, axis=axis, keepdims=True)
            is_max = v == m
            first = jnp.min(jnp.where(is_max, idx, big), axis=axis, keepdims=True)
            v = jnp.where(jnp.logical_and(is_max, idx == first), -jnp.inf, v)
        return jnp.max(v, axis=axis, keepdims=True)

    # top-k membership over the *unmasked* scores (raw log space; exp is monotone)
    row_kth = kth_largest(raw, axis=2)         # (bb, R, 1) top-k over columns (dim=2)
    col_kth = kth_largest(raw, axis=1)         # (bb, 1, S) top-k over rows    (dim=1)

    above = s_exp > jnp.float32(confidence_threshold)
    ref_corr = jnp.logical_and(raw >= row_kth, above)
    src_corr = jnp.logical_and(raw >= col_kth, above)
    if mutual:
        corr = jnp.logical_and(ref_corr, src_corr)
    else:
        corr = jnp.logical_or(ref_corr, src_corr)

    # validity mask applied AFTER the top-k membership test (exact torch semantics)
    mask = jnp.logical_and(ref_mask_ref[...] > 0.5, src_mask_ref[...] > 0.5)
    corr = jnp.logical_and(corr, mask)

    out = s_exp
    if use_global_score:
        out = out * gscore_ref[...]            # (bb,1,1) broadcast
    # Floor kept values at _TINY so the wrapper can recover corr exactly as
    # (mscore > 0) even if the global score is exactly 0.
    mscore_ref[...] = jnp.where(corr, jnp.maximum(out, jnp.float32(_TINY)),
                                jnp.float32(0.0))


def _pick_batch_block(B, R, S, target_bytes=1 << 20):
    """Batch tile so each grid step moves ~1 MiB of score data, keeping >=2 steps."""
    per_b = max(1, R * S * 4)
    bb = max(1, min(B, target_bytes // per_b))
    if B > 1 and bb >= B:
        bb = (B + 1) // 2      # keep at least 2 grid steps (v7x megacore / pipeline)
    return int(bb)


# ---------------------------------------------------------------------------
# Wrapper: dense part (Pallas)
# ---------------------------------------------------------------------------
def fine_matching_dense(score_mat, ref_knn_masks, src_knn_masks, global_scores, *,
                        k=3, mutual=True, confidence_threshold=0.05,
                        use_dustbin=False, use_global_score=False,
                        batch_block=None):
    """Dense part of FineMatching.forward.

    Returns:
        corr_mat:      (B, R, S) bool    correspondence matrix
        masked_scores: (B, R, S) float32 exp(score) * (optional global) * corr
    """
    if use_dustbin:
        # TODO(synk): dustbin row/column handling (use_dustbin=True) not implemented.
        raise NotImplementedError("use_dustbin=True is not supported")

    B, R, S = score_mat.shape
    if batch_block is None:
        batch_block = _pick_batch_block(B, R, S)
    bb = int(batch_block)
    grid = (pl.cdiv(B, bb),)   # last block may run past B; OOB writes are dropped

    # Tiny side inputs only (no full-slab padding/copies).
    ref_mask = ref_knn_masks.astype(jnp.float32)[:, :, None]     # (B, R, 1)
    src_mask = src_knn_masks.astype(jnp.float32)[:, None, :]     # (B, 1, S)
    gsc = global_scores.astype(jnp.float32)[:, None, None]       # (B, 1, 1)

    kernel = functools.partial(
        _fine_matching_kernel,
        k=k, mutual=mutual,
        confidence_threshold=confidence_threshold,
        use_global_score=use_global_score)

    # VMEM budget: in + out double-buffered plus headroom for full-slab temps.
    # (Cap at 40 MiB so it stays safe on v7x's 64 MiB physical VMEM.)
    block_bytes = bb * R * S * 4
    vmem_limit = int(min(max(12 * block_bytes, 16 << 20), 40 << 20))

    mscore = pl.pallas_call(
        kernel,
        out_shape=jax.ShapeDtypeStruct((B, R, S), jnp.float32),
        grid_spec=pltpu.PrefetchScalarGridSpec(
            num_scalar_prefetch=0,
            grid=grid,
            in_specs=[
                pl.BlockSpec((bb, R, S), lambda i: (i, 0, 0)),
                pl.BlockSpec((bb, R, 1), lambda i: (i, 0, 0)),
                pl.BlockSpec((bb, 1, S), lambda i: (i, 0, 0)),
                pl.BlockSpec((bb, 1, 1), lambda i: (i, 0, 0)),
            ],
            out_specs=pl.BlockSpec((bb, R, S), lambda i: (i, 0, 0)),
        ),
        compiler_params=pltpu.CompilerParams(
            dimension_semantics=("parallel",),
            vmem_limit_bytes=vmem_limit,
        ),
    )(score_mat, ref_mask, src_mask, gsc)

    corr = mscore > 0.0          # exact: kept entries are floored at _TINY > 0
    return corr, mscore


# ---------------------------------------------------------------------------
# Full forward (extraction uses a static upper bound; JAX has no dynamic shapes)
# ---------------------------------------------------------------------------
def fine_matching_forward(ref_knn_points, src_knn_points, ref_knn_masks,
                          src_knn_masks, score_mat, global_scores, *,
                          k=3, mutual=True, confidence_threshold=0.05,
                          use_dustbin=False, use_global_score=False,
                          max_correspondences=None):
    """FineMatching.forward.

    Returns padded fixed-size correspondences:
        ref_corr_points (C_max, 3), src_corr_points (C_max, 3),
        corr_scores (C_max,), num_corr (scalar int), valid (C_max,) bool.
    """
    corr, masked_scores = fine_matching_dense(
        score_mat, ref_knn_masks, src_knn_masks, global_scores,
        k=k, mutual=mutual, confidence_threshold=confidence_threshold,
        use_dustbin=use_dustbin, use_global_score=use_global_score)

    B, R, S = masked_scores.shape
    if max_correspondences is None:
        # mutual matching: every correspondence is in the top-k of its row.
        # (exact duplicates at the k-th value could in principle exceed this;
        #  measure-zero for real float scores.)
        max_correspondences = B * R * k if mutual else B * (R + S) * k

    # TODO(synk): torch.nonzero yields a dynamic-length result; JAX/Pallas require
    # static shapes, so we pad to a static upper bound and return a validity mask.
    # This XLA compaction is the next end-to-end bottleneck (candidate for a
    # follow-up Pallas prefix-sum/gather kernel).
    b_idx, r_idx, s_idx = jnp.nonzero(corr, size=max_correspondences, fill_value=0)
    num_corr = jnp.sum(corr)
    valid = jnp.arange(max_correspondences) < num_corr

    ref_corr_points = jnp.where(valid[:, None], ref_knn_points[b_idx, r_idx], 0.0)
    src_corr_points = jnp.where(valid[:, None], src_knn_points[b_idx, s_idx], 0.0)
    corr_scores = jnp.where(valid, masked_scores[b_idx, r_idx, s_idx], 0.0)
    return ref_corr_points, src_corr_points, corr_scores, num_corr, valid


# ---------------------------------------------------------------------------
# Pure-JAX reference mirroring the torch module exactly (topk + scatter)
# ---------------------------------------------------------------------------
def _fine_matching_dense_reference(score_mat, ref_knn_masks, src_knn_masks,
                                   global_scores, *, k, mutual,
                                   confidence_threshold, use_global_score):
    score_exp = jnp.exp(score_mat.astype(jnp.float32))
    mask_mat = jnp.logical_and(ref_knn_masks[:, :, None], src_knn_masks[:, None, :])
    B, R, S = score_exp.shape
    b_idx = jnp.arange(B)[:, None, None]

    ref_topk_scores, ref_topk_indices = jax.lax.top_k(score_exp, k)             # (B,R,k)
    r_idx = jnp.arange(R)[None, :, None]
    ref_score_mat = jnp.zeros_like(score_exp).at[b_idx, r_idx, ref_topk_indices].set(ref_topk_scores)
    ref_corr = ref_score_mat > confidence_threshold

    src_topk_scores, src_topk_indices = jax.lax.top_k(jnp.swapaxes(score_exp, 1, 2), k)  # (B,S,k)
    s_idx = jnp.arange(S)[None, :, None]
    src_score_mat = jnp.zeros_like(score_exp).at[b_idx, src_topk_indices, s_idx].set(src_topk_scores)
    src_corr = src_score_mat > confidence_threshold

    corr = jnp.logical_and(ref_corr, src_corr) if mutual else jnp.logical_or(ref_corr, src_corr)
    corr = jnp.logical_and(corr, mask_mat)

    out = score_exp
    if use_global_score:
        out = out * global_scores.astype(jnp.float32)[:, None, None]
    out = out * corr.astype(jnp.float32)
    return corr, out


if __name__ == "__main__":
    key = jax.random.PRNGKey(0)
    B, K = 2, 64          # small shapes: batch=2 patch pairs, K=64 knn points
    k_top = 3

    kp, ks, km1, km2, ksc, kg = jax.random.split(key, 6)
    ref_knn_points = jax.random.normal(kp, (B, K, 3), dtype=jnp.float32)
    src_knn_points = jax.random.normal(ks, (B, K, 3), dtype=jnp.float32)
    ref_knn_masks = jax.random.uniform(km1, (B, K)) > 0.15
    src_knn_masks = jax.random.uniform(km2, (B, K)) > 0.15
    # log-likelihood scores: wide spread so some exp() values fall below 0.05
    score_mat = 2.0 * jax.random.normal(ksc, (B, K, K), dtype=jnp.float32) - 2.0
    global_scores = jax.random.uniform(kg, (B,), dtype=jnp.float32)

    configs = [
        dict(k=k_top, mutual=True, confidence_threshold=0.05, use_global_score=False),
        dict(k=k_top, mutual=False, confidence_threshold=0.05, use_global_score=True),
    ]
    for cfg in configs:
        corr, mscores = fine_matching_dense(
            score_mat, ref_knn_masks, src_knn_masks, global_scores, **cfg)
        corr = jax.block_until_ready(corr)
        mscores = jax.block_until_ready(mscores)

        ref_corr, ref_scores = _fine_matching_dense_reference(
            score_mat, ref_knn_masks, src_knn_masks, global_scores, **cfg)

        np.testing.assert_array_equal(np.asarray(corr), np.asarray(ref_corr))
        np.testing.assert_allclose(np.asarray(mscores), np.asarray(ref_scores),
                                   atol=1e-5, rtol=1e-5)
        assert int(np.asarray(ref_corr).sum()) > 0  # test is non-trivial

    # Full forward with (statically padded) correspondence extraction.
    ref_pts, src_pts, scores, num_corr, valid = fine_matching_forward(
        ref_knn_points, src_knn_points, ref_knn_masks, src_knn_masks,
        score_mat, global_scores, k=k_top, mutual=True,
        confidence_threshold=0.05, use_global_score=False)
    scores = jax.block_until_ready(scores)
    assert ref_pts.shape == (B * K * k_top, 3)
    assert src_pts.shape == (B * K * k_top, 3)
    assert int(num_corr) == int(np.asarray(valid).sum()) > 0

    print("KERNEL_OK")
</pallas_src>

<mosaic_0001>
module attributes {stable_mosaic.version = 11 : i64} {
  func.func @_fine_matching_kernel(%arg0: i32, %arg1: memref<1x64x64xf32, #tpu.memory_space<vmem>>, %arg2: memref<1x64x1xf32, #tpu.memory_space<vmem>>, %arg3: memref<1x1x64xf32, #tpu.memory_space<vmem>>, %arg4: memref<1x1x1xf32, #tpu.memory_space<vmem>>, %arg5: memref<1x64x64xf32, #tpu.memory_space<vmem>>) attributes {dimension_semantics = [#tpu.dimension_semantics<parallel>], iteration_bounds = array<i64: 2>, scalar_prefetch = 0 : i64, scratch_operands = 0 : i64, tpu.core_type = #tpu.core_type<tc>, window_params = [{transform_indices = @transform_0, window_bounds = array<i64: 1, 64, 64>}, {transform_indices = @transform_1, window_bounds = array<i64: 1, 64, 1>}, {transform_indices = @transform_2, window_bounds = array<i64: 1, 1, 64>}, {transform_indices = @transform_3, window_bounds = array<i64: 1, 1, 1>}, {transform_indices = @transform_4, window_bounds = array<i64: 1, 64, 64>}]} {
    %c0 = arith.constant 0 : index
    %c0_0 = arith.constant 0 : index
    %c0_1 = arith.constant 0 : index
    %0 = vector.load %arg1[%c0, %c0_0, %c0_1] : memref<1x64x64xf32, #tpu.memory_space<vmem>>, vector<1x64x64xf32>
    %1 = math.exp %0 : vector<1x64x64xf32>
    %2 = tpu.iota {dimensions = array<i32: 2>} : vector<1x64x64xi32>
    %cst = arith.constant dense<0xFF800000> : vector<1x64xf32>
    %3 = vector.multi_reduction <maximumf>, %0, %cst [2] : vector<1x64x64xf32> to vector<1x64xf32>
    %4 = vector.shape_cast %3 : vector<1x64xf32> to vector<1x64x1xf32>
    %5 = vector.broadcast %4 : vector<1x64x1xf32> to vector<1x64x64xf32>
    %6 = arith.cmpf oeq, %0, %5 : vector<1x64x64xf32>
    %c64_i32 = arith.constant 64 : i32
    %7 = vector.broadcast %c64_i32 : i32 to vector<1x64x64xi32>
    %8 = arith.select %6, %2, %7 : vector<1x64x64xi1>, vector<1x64x64xi32>
    %cst_2 = arith.constant dense<2147483647> : vector<1x64xi32>
    %9 = vector.multi_reduction <minsi>, %8, %cst_2 [2] : vector<1x64x64xi32> to vector<1x64xi32>
    %10 = vector.shape_cast %9 : vector<1x64xi32> to vector<1x64x1xi32>
    %11 = vector.broadcast %10 : vector<1x64x1xi32> to vector<1x64x64xi32>
    %12 = arith.cmpi eq, %2, %11 : vector<1x64x64xi32>
    %13 = arith.andi %6, %12 : vector<1x64x64xi1>
    %cst_3 = arith.constant 0xFF800000 : f32
    %14 = vector.broadcast %cst_3 : f32 to vector<1x64x64xf32>
    %15 = arith.select %13, %14, %0 : vector<1x64x64xi1>, vector<1x64x64xf32>
    %cst_4 = arith.constant dense<0xFF800000> : vector<1x64xf32>
    %16 = vector.multi_reduction <maximumf>, %15, %cst_4 [2] : vector<1x64x64xf32> to vector<1x64xf32>
    %17 = vector.shape_cast %16 : vector<1x64xf32> to vector<1x64x1xf32>
    %18 = vector.broadcast %17 : vector<1x64x1xf32> to vector<1x64x64xf32>
    %19 = arith.cmpf oeq, %15, %18 : vector<1x64x64xf32>
    %c64_i32_5 = arith.constant 64 : i32
    %20 = vector.broadcast %c64_i32_5 : i32 to vector<1x64x64xi32>
    %21 = arith.select %19, %2, %20 : vector<1x64x64xi1>, vector<1x64x64xi32>
    %cst_6 = arith.constant dense<2147483647> : vector<1x64xi32>
    %22 = vector.multi_reduction <minsi>, %21, %cst_6 [2] : vector<1x64x64xi32> to vector<1x64xi32>
    %23 = vector.shape_cast %22 : vector<1x64xi32> to vector<1x64x1xi32>
    %24 = vector.broadcast %23 : vector<1x64x1xi32> to vector<1x64x64xi32>
    %25 = arith.cmpi eq, %2, %24 : vector<1x64x64xi32>
    %26 = arith.andi %19, %25 : vector<1x64x64xi1>
    %cst_7 = arith.constant 0xFF800000 : f32
    %27 = vector.broadcast %cst_7 : f32 to vector<1x64x64xf32>
    %28 = arith.select %26, %27, %15 : vector<1x64x64xi1>, vector<1x64x64xf32>
    %cst_8 = arith.constant dense<0xFF800000> : vector<1x64xf32>
    %29 = vector.multi_reduction <maximumf>, %28, %cst_8 [2] : vector<1x64x64xf32> to vector<1x64xf32>
    %30 = vector.shape_cast %29 : vector<1x64xf32> to vector<1x64x1xf32>
    %31 = tpu.iota {dimensions = array<i32: 1>} : vector<1x64x64xi32>
    %cst_9 = arith.constant dense<0xFF800000> : vector<1x64xf32>
    %32 = vector.multi_reduction <maximumf>, %0, %cst_9 [1] : vector<1x64x64xf32> to vector<1x64xf32>
    %33 = vector.shape_cast %32 : vector<1x64xf32> to vector<1x1x64xf32>
    %34 = vector.broadcast %33 : vector<1x1x64xf32> to vector<1x64x64xf32>
    %35 = arith.cmpf oeq, %0, %34 : vector<1x64x64xf32>
    %c64_i32_10 = arith.constant 64 : i32
    %36 = vector.broadcast %c64_i32_10 : i32 to vector<1x64x64xi32>
    %37 = arith.select %35, %31, %36 : vector<1x64x64xi1>, vector<1x64x64xi32>
    %cst_11 = arith.constant dense<2147483647> : vector<1x64xi32>
    %38 = vector.multi_reduction <minsi>, %37, %cst_11 [1] : vector<1x64x64xi32> to vector<1x64xi32>
    %39 = vector.shape_cast %38 : vector<1x64xi32> to vector<1x1x64xi32>
    %40 = vector.broadcast %39 : vector<1x1x64xi32> to vector<1x64x64xi32>
    %41 = arith.cmpi eq, %31, %40 : vector<1x64x64xi32>
    %42 = arith.andi %35, %41 : vector<1x64x64xi1>
    %cst_12 = arith.constant 0xFF800000 : f32
    %43 = vector.broadcast %cst_12 : f32 to vector<1x64x64xf32>
    %44 = arith.select %42, %43, %0 : vector<1x64x64xi1>, vector<1x64x64xf32>
    %cst_13 = arith.constant dense<0xFF800000> : vector<1x64xf32>
    %45 = vector.multi_reduction <maximumf>, %44, %cst_13 [1] : vector<1x64x64xf32> to vector<1x64xf32>
    %46 = vector.shape_cast %45 : vector<1x64xf32> to vector<1x1x64xf32>
    %47 = vector.broadcast %46 : vector<1x1x64xf32> to vector<1x64x64xf32>
    %48 = arith.cmpf oeq, %44, %47 : vector<1x64x64xf32>
    %c64_i32_14 = arith.constant 64 : i32
    %49 = vector.broadcast %c64_i32_14 : i32 to vector<1x64x64xi32>
    %50 = arith.select %48, %31, %49 : vector<1x64x64xi1>, vector<1x64x64xi32>
    %cst_15 = arith.constant dense<2147483647> : vector<1x64xi32>
    %51 = vector.multi_reduction <minsi>, %50, %cst_15 [1] : vector<1x64x64xi32> to vector<1x64xi32>
    %52 = vector.shape_cast %51 : vector<1x64xi32> to vector<1x1x64xi32>
    %53 = vector.broadcast %52 : vector<1x1x64xi32> to vector<1x64x64xi32>
    %54 = arith.cmpi eq, %31, %53 : vector<1x64x64xi32>
    %55 = arith.andi %48, %54 : vector<1x64x64xi1>
    %cst_16 = arith.constant 0xFF800000 : f32
    %56 = vector.broadcast %cst_16 : f32 to vector<1x64x64xf32>
    %57 = arith.select %55, %56, %44 : vector<1x64x64xi1>, vector<1x64x64xf32>
    %cst_17 = arith.constant dense<0xFF800000> : vector<1x64xf32>
    %58 = vector.multi_reduction <maximumf>, %57, %cst_17 [1] : vector<1x64x64xf32> to vector<1x64xf32>
    %59 = vector.shape_cast %58 : vector<1x64xf32> to vector<1x1x64xf32>
    %cst_18 = arith.constant 5.000000e-02 : f32
    %60 = vector.broadcast %cst_18 : f32 to vector<1x64x64xf32>
    %61 = arith.cmpf ogt, %1, %60 : vector<1x64x64xf32>
    %62 = vector.broadcast %30 : vector<1x64x1xf32> to vector<1x64x64xf32>
    %63 = arith.cmpf oge, %0, %62 : vector<1x64x64xf32>
    %64 = arith.andi %63, %61 : vector<1x64x64xi1>
    %65 = vector.broadcast %59 : vector<1x1x64xf32> to vector<1x64x64xf32>
    %66 = arith.cmpf oge, %0, %65 : vector<1x64x64xf32>
    %67 = arith.andi %66, %61 : vector<1x64x64xi1>
    %68 = arith.andi %64, %67 : vector<1x64x64xi1>
    %c0_19 = arith.constant 0 : index
    %c0_20 = arith.constant 0 : index
    %c0_21 = arith.constant 0 : index
    %69 = vector.load %arg2[%c0_19, %c0_20, %c0_21] : memref<1x64x1xf32, #tpu.memory_space<vmem>>, vector<1x64x1xf32>
    %cst_22 = arith.constant 5.000000e-01 : f32
    %70 = vector.broadcast %cst_22 : f32 to vector<1x64x1xf32>
    %71 = arith.cmpf ogt, %69, %70 : vector<1x64x1xf32>
    %c0_23 = arith.constant 0 : index
    %c0_24 = arith.constant 0 : index
    %c0_25 = arith.constant 0 : index
    %72 = vector.load %arg3[%c0_23, %c0_24, %c0_25] : memref<1x1x64xf32, #tpu.memory_space<vmem>>, vector<1x1x64xf32>
    %cst_26 = arith.constant 5.000000e-01 : f32
    %73 = vector.broadcast %cst_26 : f32 to vector<1x1x64xf32>
    %74 = arith.cmpf ogt, %72, %73 : vector<1x1x64xf32>
    %75 = vector.broadcast %71 : vector<1x64x1xi1> to vector<1x64x64xi1>
    %76 = vector.broadcast %74 : vector<1x1x64xi1> to vector<1x64x64xi1>
    %77 = arith.andi %75, %76 : vector<1x64x64xi1>
    %78 = arith.andi %68, %77 : vector<1x64x64xi1>
    %cst_27 = arith.constant 9.99999991E-38 : f32
    %79 = vector.broadcast %cst_27 : f32 to vector<1x64x64xf32>
    %80 = arith.maximumf %1, %79 : vector<1x64x64xf32>
    %cst_28 = arith.constant 0.000000e+00 : f32
    %81 = vector.broadcast %cst_28 : f32 to vector<1x64x64xf32>
    %82 = arith.select %78, %80, %81 : vector<1x64x64xi1>, vector<1x64x64xf32>
    %c0_29 = arith.constant 0 : index
    %c0_30 = arith.constant 0 : index
    %c0_31 = arith.constant 0 : index
    %83 = vector.load %arg5[%c0_29, %c0_30, %c0_31] : memref<1x64x64xf32, #tpu.memory_space<vmem>>, vector<1x64x64xf32>
    tpu.vector_store %arg5[%c0_29, %c0_30, %c0_31], %82 {strides = array<i32>} : memref<1x64x64xf32, #tpu.memory_space<vmem>>, vector<1x64x64xf32>,
    return
  }
  func.func @transform_0(%arg0: i32) -> (i32, i32, i32) {
    %c0_i32 = arith.constant 0 : i32
    %c0_i32_0 = arith.constant 0 : i32
    %c0_i32_1 = arith.constant 0 : i32
    return %arg0, %c0_i32, %c0_i32_0 : i32, i32, i32
  }
  func.func @transform_1(%arg0: i32) -> (i32, i32, i32) {
    %c0_i32 = arith.constant 0 : i32
    %c0_i32_0 = arith.constant 0 : i32
    %c0_i32_1 = arith.constant 0 : i32
    return %arg0, %c0_i32, %c0_i32_0 : i32, i32, i32
  }
  func.func @transform_2(%arg0: i32) -> (i32, i32, i32) {
    %c0_i32 = arith.constant 0 : i32
    %c0_i32_0 = arith.constant 0 : i32
    %c0_i32_1 = arith.constant 0 : i32
    return %arg0, %c0_i32, %c0_i32_0 : i32, i32, i32
  }
  func.func @transform_3(%arg0: i32) -> (i32, i32, i32) {
    %c0_i32 = arith.constant 0 : i32
    %c0_i32_0 = arith.constant 0 : i32
    %c0_i32_1 = arith.constant 0 : i32
    return %arg0, %c0_i32, %c0_i32_0 : i32, i32, i32
  }
  func.func @transform_4(%arg0: i32) -> (i32, i32, i32) {
    %c0_i32 = arith.constant 0 : i32
    %c0_i32_0 = arith.constant 0 : i32
    %c0_i32_1 = arith.constant 0 : i32
    return %arg0, %c0_i32, %c0_i32_0 : i32, i32, i32
  }
}

</mosaic_0001>

<bundles_post_ra>
// kernel: tpu_custom_call.1
= control target key start
LH: loop header
LB: loop body
LE: loop exit
PB: predicated region body
PF: predicated region fallthrough
CT: control target
= control target key end

     0   :  { %9 = vsyncpa [#allocation3], 0  ;;  %s2324_s0 = inlined_call_operand.vmem [shape: f32[2,64,64], index: 0, kind: input, shape index: {}]   ;;  %s2325_s1 = inlined_call_operand.vmem [shape: f32[2,64,1], index: 1, kind: input, shape index: {}]   ;;  %s2326_s2 = inlined_call_operand.vmem [shape: f32[2,1,64], index: 2, kind: input, shape index: {}]   ;;  %s2327_s3 = inlined_call_operand.vmem [shape: f32[2,1,1], index: 3, kind: input, shape index: {}]   ;;  %s2328_s4 = inlined_call_operand.hbm [shape: f32[2,64,64], index: 4, kind: output, shape index: {}]  }
   0x1   :  { %11 = vsyncpa [#allocation3 + $0x1], 0  ;;  %s1305_s15 = smov 0   ;;  %s1307_s16 = smov 0  }
   0x2   :  { %s1309_s17 = smov 0   ;;  %s1311_s18 = smov 0  }
   0x3 LB: > { %s1326_s3 = sadd.s32 4294967295, %s1274_s18   ;;  %s1127_s19 = sadd.s32 4294967294, %s1274_s18   ;;  %s1274_s18 = sphi %s1311_s18, %s2490_s18   ;;  %s1270_s17 = sphi %s1309_s17, %s2489_s17   ;;  %s1266_s16 = sphi %s1307_s16, %s2488_s16   ;;  %s1262_s15 = sphi %s1305_s15, %s2487_s15  }
   0x4   : > { %s1330_s20 = sadd.s32 1, %s1274_s18   ;;  %s128_s21 = sadd.s32 1, %s1270_s17 }
   0x5   : > { %s125_s22 = ssub.s32 %s1274_s18, %s1330_s20  ;;  %p138_p0 = scmp.ne.s32.totalorder %s1270_s17, %s1266_s16 }
   0x6   : > { %p126_p1 = scmp.eq.s32.totalorder %s125_s22, 0  ;;  %p139_p2 = scmp.eq.s32.totalorder %s1326_s3, 1 }
   0x7   : > { %p144_p3 = scmp.ne.s32.totalorder %s1266_s16, %s1262_s15  ;;  %p145_p4 = scmp.eq.s32.totalorder %s1127_s19, 1 }
   0x8   : > { %s1341_s23 = scalar_select %p126_p1, %s1270_s17, %s128_s21  }
   0x9   : > { %p1343_p5 = por %p139_p2, %p138_p0  ;;  %p1347_p6 = por %p145_p4, %p144_p3 }
   0xa   : > { %p1130_p7 = scmp.ge.s32.totalorder %s1274_s18, 1  ;;  %p191_p8 = scmp.lt.s32.totalorder %s1274_s18, 3 }
   0xc   : > { %p192_p9 = pnand %p1130_p7, %p191_p8 }
   0xe   : > { %195 = sbr.rel (%p192_p9) target bundleno = 1168 (0x490), region = 36 }
  0x15   : > { %p228_p10 = scmp.lt.s32.totalorder %s1326_s3, 1  ;;  %vm2334_vm0 = vcmask 523264   ;;  %v268_v25 = vlaneseq  ;;  %s225_s11 = sand.u32 1, %s1266_s16  }
  0x16   : > { %s1131_s12 = sshll.u32 %s225_s11, 6  ;;  %s1143_s14 = sshll.u32 %s1326_s3, 10 }
  0x17   : > { %s1355_s26 = scalar_select %p228_p10, %s1326_s3, 1  ;;  %v1406_v27 = vshrl.u32 %v268_v25, 7 }
  0x18   : > { %s2193_s13 = scalar_lea.vmem [#allocation2], %s1131_s12  ;;  %s2283_s3 = scalar_lea.sflag [#allocation3], %s225_s11 }
  0x19   : > { %s1141_s27 = sshll.u32 %s1355_s26, 6  ;;  %v1409_v30 = vadd.s32 8, %v1406_v27  ;;  %v1412_v31 = vadd.s32 16, %v1406_v27  ;;  %v1415_v32 = vadd.s32 24, %v1406_v27  ;;  %v1420_v34 = vadd.s32 32, %v1406_v27  ;;  %s240_s10 = scalar_lea.vmem %s2326_s2, %s1355_s26 }
  0x1a   : > { %s1363_s30 = scalar_lea.vmem %s2324_s0, %s1141_s27  ;;  %v1423_v35 = vadd.s32 40, %v1406_v27  ;;  %v1426_v36 = vadd.s32 48, %v1406_v27  ;;  %v1429_v37 = vadd.s32 56, %v1406_v27  ;;  %s2026_s7 = scalar_lea.vmem %s2325_s1, %s1141_s27 }
  0x1b   : > { %v1366_v0 = vld [vmem:[%s1363_s30] sm:$0xff]  ;;  %v1369_v1 = vld [vmem:[%s1363_s30 + $0x10] sm:$0xff]  ;;  %v1372_v2 = vld [vmem:[%s1363_s30 + $0x8] sm:$0xff]  ;;  %s1035_s19 = sshll.u32 %s2193_s13, 4  ;;  %s2275_s26 = scalar_lea.hbm %s2328_s4, %s1143_s14  ;;  %s2277_s19 = int_to_ptr.vmem [resolvable:$true] %s1035_s19 }
  0x1c   : > { %v271_v3 = vsel %vm2334_vm0, %v1366_v0, -inf  ;;  %v277_v4 = vsel %vm2334_vm0, %v1369_v1, -inf  ;;  %v1379_v5 = vld [vmem:[%s1363_s30 + $0x18] sm:$0xff]  ;;  %v1382_v6 = vld [vmem:[%s1363_s30 + $0x20] sm:$0xff]  ;;  %v1385_v7 = vld [vmem:[%s1363_s30 + $0x28] sm:$0xff]  ;;  %v274_v8 = vsel %vm2334_vm0, %v1372_v2, -inf }
  0x1d   : > { %272 = vmax.xlane.f32.xlu0 %v271_v3  ;;  %278 = vmax.xlane.f32.xlu1 %v277_v4  ;;  %v280_v9 = vsel %vm2334_vm0, %v1379_v5, -inf  ;;  %v283_v10 = vsel %vm2334_vm0, %v1382_v6, -inf  ;;  %v286_v11 = vsel %vm2334_vm0, %v1385_v7, -inf  ;;  %v1396_v12 = vld [vmem:[%s1363_s30 + $0x30] sm:$0xff]  ;;  %v1399_v13 = vld [vmem:[%s1363_s30 + $0x38] sm:$0xff]  ;;  %s1212_s27 = scalar_lea.vmem %s2277_s19, 1024 }
  0x1e   : > { %v672_v14 = vmax.f32 %v271_v3, %v283_v10  ;;  %v673_v15 = vmax.f32 %v274_v8, %v286_v11  ;;  %v289_v16 = vsel %vm2334_vm0, %v1396_v12, -inf  ;;  %v292_v17 = vsel %vm2334_vm0, %v1399_v13, -inf  ;;  %p1213_p11 = scmp.ne.s32.totalorder %s2277_s19, %s1212_s27  ;;  %s1277_s28 = smov [#allocation2]  }
  0x1f   : > { %v674_v18 = vmax.f32 %v277_v4, %v289_v16  ;;  %v675_v19 = vmax.f32 %v280_v9, %v292_v17  ;;  %s1216_s29 = sshll.u32 %s1277_s28, 4  ;;  %s1217_s29 = int_to_ptr.vmem [resolvable:$false] %s1216_s29 }
  0x20   : > { %v676_v20 = vmax.f32 %v672_v14, %v673_v15  ;;  %p1214_p12 = pnand %p1213_p11, %p1343_p5  ;;  %p1219_p0 = scmp.lt.s32.totalorder %s2277_s19, %s1217_s29 }
  0x21   : > { %275 = vmax.xlane.f32.xlu0 %v274_v8  ;;  %281 = vmax.xlane.f32.xlu1 %v280_v9  ;;  %v677_v21 = vmax.f32 %v674_v18, %v675_v19 }
  0x22   : > { %p1215_p13 = pneg %p1214_p12 }
  0x23   : > { %v678_v22 = vmax.f32 %v676_v20, %v677_v21 }
  0x25   : > { %284 = vmax.xlane.f32.xlu0 %v283_v10  ;;  %287 = vmax.xlane.f32.xlu1 %v286_v11  ;;  %v679_v23 = vrot.slane %v678_v22, 4 }
  0x27   : > { %v680_v24 = vmax.f32 %v678_v22, %v679_v23 }
  0x29   : > { %290 = vmax.xlane.f32.xlu0 %v289_v16  ;;  %293 = vmax.xlane.f32.xlu1 %v292_v17  ;;  %v681_v26 = vrot.slane %v680_v24, 2 }
  0x2b   : > { %v682_v28 = vmax.f32 %v680_v24, %v681_v26 }
  0x2d   : > { %v683_v29 = vrot.slane %v682_v28, 1 }
  0x2f   : > { %v1417_v33 = vmax.f32 %v682_v28, %v683_v29 }
  0x31   : > { %vm685_vm1 = vcmp.eq.f32.partialorder %v1366_v0, %v1417_v33  ;;  %vm686_vm2 = vcmp.eq.f32.partialorder %v1372_v2, %v1417_v33  ;;  %vm687_vm3 = vcmp.eq.f32.partialorder %v1369_v1, %v1417_v33  ;;  %vm688_vm4 = vcmp.eq.f32.partialorder %v1379_v5, %v1417_v33 }
  0x32   : > { %vm689_vm5 = vcmp.eq.f32.partialorder %v1382_v6, %v1417_v33  ;;  %vm2331_vm6 = vcmp.eq.f32.partialorder %v1385_v7, %v1417_v33  ;;  %vm2330_vm7 = vcmp.eq.f32.partialorder %v1396_v12, %v1417_v33  ;;  %vm2329_vm8 = vcmp.eq.f32.partialorder %v1399_v13, %v1417_v33 }
  0x33   : > { %v693_v38 = vsel %vm685_vm1, %v1406_v27, 64  ;;  %v694_v39 = vsel %vm686_vm2, %v1409_v30, 64  ;;  %v695_v40 = vsel %vm687_vm3, %v1412_v31, 64  ;;  %v696_v41 = vsel %vm688_vm4, %v1415_v32, 64 }
  0x34   : > { %v697_v42 = vsel %vm689_vm5, %v1420_v34, 64  ;;  %v698_v43 = vsel %vm2331_vm6, %v1423_v35, 64  ;;  %v699_v44 = vsel %vm2330_vm7, %v1426_v36, 64  ;;  %v700_v45 = vsel %vm2329_vm8, %v1429_v37, 64 }
  0x35   : > { %v701_v46 = vsel %vm2334_vm0, %v693_v38, 2147483647  ;;  %v702_v47 = vsel %vm2334_vm0, %v694_v39, 2147483647  ;;  %v703_v48 = vsel %vm2334_vm0, %v695_v40, 2147483647 }
  0x36   : > { %v704_v49 = vsel %vm2334_vm0, %v696_v41, 2147483647  ;;  %v705_v50 = vsel %vm2334_vm0, %v697_v42, 2147483647  ;;  %v708_v51 = vsel %vm2334_vm0, %v698_v43, 2147483647 }
  0x37   : > { %vm706_vm9 = vcmp.lt.s32.totalorder %v701_v46, %v705_v50  ;;  %vm709_vm10 = vcmp.lt.s32.totalorder %v702_v47, %v708_v51  ;;  %v711_v52 = vsel %vm2334_vm0, %v699_v44, 2147483647  ;;  %v714_v53 = vsel %vm2334_vm0, %v700_v45, 2147483647 }
  0x38   : > { %v707_v54 = vsel %vm706_vm9, %v701_v46, %v705_v50  ;;  %v710_v55 = vsel %vm709_vm10, %v702_v47, %v708_v51  ;;  %vm712_vm11 = vcmp.lt.s32.totalorder %v703_v48, %v711_v52  ;;  %vm715_vm12 = vcmp.lt.s32.totalorder %v704_v49, %v714_v53 }
  0x39   : > { %v713_v56 = vsel %vm712_vm11, %v703_v48, %v711_v52  ;;  %v716_v57 = vsel %vm715_vm12, %v704_v49, %v714_v53  ;;  %vm717_vm13 = vcmp.lt.s32.totalorder %v707_v54, %v710_v55 }
  0x3a   : > { %v718_v58 = vsel %vm717_vm13, %v707_v54, %v710_v55  ;;  %vm719_vm14 = vcmp.lt.s32.totalorder %v713_v56, %v716_v57 }
  0x3b   : > { %v720_v59 = vsel %vm719_vm14, %v713_v56, %v716_v57 }
  0x3c   : > { %vm721_vm15 = vcmp.lt.s32.totalorder %v718_v58, %v720_v59 }
  0x3d   : > { %v722_v60 = vsel %vm721_vm15, %v718_v58, %v720_v59 }
  0x3e   : > { %v723_v61 = vrot.slane %v722_v60, 4 }
  0x40   : > { %vm724_vm8 = vcmp.lt.s32.totalorder %v722_v60, %v723_v61 }
  0x41   : > { %v725_v62 = vsel %vm724_vm8, %v722_v60, %v723_v61 }
  0x42   : > { %v726_v63 = vrot.slane %v725_v62, 2 }
  0x44   : > { %vm727_vm7 = vcmp.lt.s32.totalorder %v725_v62, %v726_v63 }
  0x45   : > { %v728_v3 = vsel %vm727_vm7, %v725_v62, %v726_v63 }
  0x46   : > { %v729_v4 = vrot.slane %v728_v3, 1 }
  0x48   : > { %vm730_vm6 = vcmp.lt.s32.totalorder %v728_v3, %v729_v4 }
  0x49   : > { %v731_v8 = vsel %vm730_vm6, %v728_v3, %v729_v4 }
  0x4a   : > { %vm732_vm9 = vcmp.eq.s32.totalorder %v1406_v27, %v731_v8  ;;  %vm733_vm10 = vcmp.eq.s32.totalorder %v1409_v30, %v731_v8  ;;  %vm734_vm11 = vcmp.eq.s32.totalorder %v1412_v31, %v731_v8  ;;  %vm735_vm12 = vcmp.eq.s32.totalorder %v1415_v32, %v731_v8 }
  0x4b   : > { %vm740_vm13 = vmand %vm685_vm1, %vm732_vm9  ;;  %vm736_vm8 = vcmp.eq.s32.totalorder %v1420_v34, %v731_v8  ;;  %vm737_vm6 = vcmp.eq.s32.totalorder %v1423_v35, %v731_v8  ;;  %vm738_vm1 = vcmp.eq.s32.totalorder %v1426_v36, %v731_v8 }
  0x4c   : > { %vm741_vm7 = vmand %vm686_vm2, %vm733_vm10  ;;  %v1499_v9 = vsel %vm740_vm13, -inf, %v1366_v0  ;;  %vm739_vm2 = vcmp.eq.s32.totalorder %v1429_v37, %v731_v8 }
  0x4d   : > { %vm742_vm14 = vmand %vm687_vm3, %vm734_vm11  ;;  %v1506_v10 = vsel %vm741_vm7, -inf, %v1372_v2  ;;  %v756_v15 = vsel %vm2334_vm0, %v1499_v9, -inf  ;;  %vm2352_vm3 = vcmp.eq.f32.partialorder %v1385_v7, %v1417_v33  ;;  %vm2354_vm11 = vcmp.eq.f32.partialorder %v1399_v13, %v1417_v33 }
  0x4e   : > { %vm743_vm15 = vmand %vm688_vm4, %vm735_vm12  ;;  %v1513_v11 = vsel %vm742_vm14, -inf, %v1369_v1  ;;  %v757_v17 = vsel %vm2334_vm0, %v1506_v10, -inf  ;;  %vm2353_vm4 = vcmp.eq.f32.partialorder %v1396_v12, %v1417_v33 }
  0x4f   : > { %vm744_vm9 = vmand %vm689_vm5, %vm736_vm8  ;;  %v1520_v14 = vsel %vm743_vm15, -inf, %v1379_v5  ;;  %v758_v19 = vsel %vm2334_vm0, %v1513_v11, -inf }
  0x50   : > { %vm745_vm10 = vmand %vm2352_vm3, %vm737_vm6  ;;  %v1528_v16 = vsel %vm744_vm9, -inf, %v1382_v6  ;;  %v759_v22 = vsel %vm2334_vm0, %v1520_v14, -inf }
  0x51   : > { %vm746_vm5 = vmand %vm2353_vm4, %vm738_vm1  ;;  %v1536_v18 = vsel %vm745_vm10, -inf, %v1385_v7  ;;  %v760_v20 = vsel %vm2334_vm0, %v1528_v16, -inf }
  0x52   : > { %vm747_vm12 = vmand %vm2354_vm11, %vm739_vm2  ;;  %v1546_v21 = vsel %vm746_vm5, -inf, %v1396_v12  ;;  %v761_v23 = vmax.f32 %v756_v15, %v760_v20  ;;  %v762_v24 = vsel %vm2334_vm0, %v1536_v18, -inf }
  0x53   : > { %v1553_v26 = vsel %vm747_vm12, -inf, %v1399_v13  ;;  %v763_v28 = vmax.f32 %v757_v17, %v762_v24  ;;  %v764_v29 = vsel %vm2334_vm0, %v1546_v21, -inf }
  0x54   : > { %2355 = vst [vmem:[#allocation5_spill] sm:$0xff] %v1553_v26  ;;  %v765_v38 = vmax.f32 %v758_v19, %v764_v29  ;;  %v766_v33 = vsel %vm2334_vm0, %v1553_v26, -inf }
  0x55   : > { %v767_v39 = vmax.f32 %v759_v22, %v766_v33  ;;  %v768_v40 = vmax.f32 %v761_v23, %v763_v28 }
  0x57   : > { %v769_v41 = vmax.f32 %v765_v38, %v767_v39 }
  0x59   : > { %v770_v42 = vmax.f32 %v768_v40, %v769_v41 }
  0x5b   : > { %v771_v43 = vrot.slane %v770_v42, 4 }
  0x5d   : > { %v772_v44 = vmax.f32 %v770_v42, %v771_v43  ;;  %v2369_v43 = vmov 0 }
  0x5f   : > { %v773_v45 = vrot.slane %v772_v44, 2 }
  0x61   : > { %v774_v46 = vmax.f32 %v772_v44, %v773_v45 }
  0x63   : > { %v775_v47 = vrot.slane %v774_v46, 1 }
  0x65   : > { %v1559_v48 = vmax.f32 %v774_v46, %v775_v47  ;;  %v1704_v46 = vand.u32 127, %v268_v25 }
  0x67   : > { %vm2332_vm13 = vcmp.eq.f32.partialorder %v1499_v9, %v1559_v48  ;;  %vm778_vm8 = vcmp.eq.f32.partialorder %v1506_v10, %v1559_v48  ;;  %vm779_vm7 = vcmp.eq.f32.partialorder %v1513_v11, %v1559_v48  ;;  %vm780_vm6 = vcmp.eq.f32.partialorder %v1520_v14, %v1559_v48 }
  0x68   : > { %vm781_vm14 = vcmp.eq.f32.partialorder %v1528_v16, %v1559_v48  ;;  %vm782_vm1 = vcmp.eq.f32.partialorder %v1536_v18, %v1559_v48  ;;  %vm783_vm15 = vcmp.eq.f32.partialorder %v1546_v21, %v1559_v48  ;;  %vm2333_vm2 = vcmp.eq.f32.partialorder %v1553_v26, %v1559_v48 }
  0x69   : > { %v785_v49 = vsel %vm2332_vm13, %v1406_v27, 64  ;;  %v786_v50 = vsel %vm778_vm8, %v1409_v30, 64  ;;  %v787_v51 = vsel %vm779_vm7, %v1412_v31, 64  ;;  %v788_v52 = vsel %vm780_vm6, %v1415_v32, 64 }
  0x6a   : > { %v789_v53 = vsel %vm781_vm14, %v1420_v34, 64  ;;  %v790_v54 = vsel %vm782_vm1, %v1423_v35, 64  ;;  %v791_v55 = vsel %vm783_vm15, %v1426_v36, 64  ;;  %v792_v56 = vsel %vm2333_vm2, %v1429_v37, 64 }
  0x6b   : > { %v793_v57 = vsel %vm2334_vm0, %v785_v49, 2147483647  ;;  %v794_v58 = vsel %vm2334_vm0, %v786_v50, 2147483647  ;;  %v795_v59 = vsel %vm2334_vm0, %v787_v51, 2147483647 }
  0x6c   : > { %v796_v60 = vsel %vm2334_vm0, %v788_v52, 2147483647  ;;  %v797_v61 = vsel %vm2334_vm0, %v789_v53, 2147483647  ;;  %v800_v62 = vsel %vm2334_vm0, %v790_v54, 2147483647 }
  0x6d   : > { %vm798_vm9 = vcmp.lt.s32.totalorder %v793_v57, %v797_v61  ;;  %vm801_vm3 = vcmp.lt.s32.totalorder %v794_v58, %v800_v62  ;;  %v803_v63 = vsel %vm2334_vm0, %v791_v55, 2147483647  ;;  %v806_v3 = vsel %vm2334_vm0, %v792_v56, 2147483647 }
  0x6e   : > { %v799_v4 = vsel %vm798_vm9, %v793_v57, %v797_v61  ;;  %v802_v8 = vsel %vm801_vm3, %v794_v58, %v800_v62  ;;  %vm804_vm10 = vcmp.lt.s32.totalorder %v795_v59, %v803_v63  ;;  %vm807_vm4 = vcmp.lt.s32.totalorder %v796_v60, %v806_v3 }
  0x6f   : > { %v805_v15 = vsel %vm804_vm10, %v795_v59, %v803_v63  ;;  %v808_v17 = vsel %vm807_vm4, %v796_v60, %v806_v3  ;;  %vm809_vm5 = vcmp.lt.s32.totalorder %v799_v4, %v802_v8 }
  0x70   : > { %v810_v19 = vsel %vm809_vm5, %v799_v4, %v802_v8  ;;  %vm811_vm11 = vcmp.lt.s32.totalorder %v805_v15, %v808_v17 }
  0x71   : > { %v812_v20 = vsel %vm811_vm11, %v805_v15, %v808_v17 }
  0x72   : > { %vm813_vm12 = vcmp.lt.s32.totalorder %v810_v19, %v812_v20 }
  0x73   : > { %v814_v22 = vsel %vm813_vm12, %v810_v19, %v812_v20 }
  0x74   : > { %v815_v23 = vrot.slane %v814_v22, 4 }
  0x76   : > { %vm816_vm13 = vcmp.lt.s32.totalorder %v814_v22, %v815_v23 }
  0x77   : > { %v817_v24 = vsel %vm816_vm13, %v814_v22, %v815_v23 }
  0x78   : > { %v818_v28 = vrot.slane %v817_v24, 2 }
  0x7a   : > { %vm819_vm2 = vcmp.lt.s32.totalorder %v817_v24, %v818_v28 }
  0x7b   : > { %v820_v29 = vsel %vm819_vm2, %v817_v24, %v818_v28 }
  0x7c   : > { %v821_v38 = vrot.slane %v820_v29, 1 }
  0x7e   : > { %vm822_vm0 = vcmp.lt.s32.totalorder %v820_v29, %v821_v38 }
  0x7f   : > { %v1617_v33 = vsel %vm822_vm0, %v820_v29, %v821_v38 }
  0x80   : > { %vm825_vm9 = vcmp.eq.s32.totalorder %v1409_v30, %v1617_v33  ;;  %vm826_vm3 = vcmp.eq.s32.totalorder %v1412_v31, %v1617_v33  ;;  %vm827_vm10 = vcmp.eq.s32.totalorder %v1415_v32, %v1617_v33  ;;  %vm828_vm4 = vcmp.eq.s32.totalorder %v1420_v34, %v1617_v33 }
  0x81   : > { %vm829_vm13 = vcmp.eq.s32.totalorder %v1423_v35, %v1617_v33  ;;  %vm830_vm2 = vcmp.eq.s32.totalorder %v1426_v36, %v1617_v33  ;;  %vm831_vm0 = vcmp.eq.s32.totalorder %v1429_v37, %v1617_v33  ;;  %vm1636_vm5 = vmand %vm778_vm8, %vm825_vm9 }
  0x82   : > { %vm1643_vm11 = vmand %vm779_vm7, %vm826_vm3  ;;  %vm2372_vm3 = vcmask 523264  }
  0x83   : > { %vm1653_vm12 = vmand %vm780_vm6, %vm827_vm10 }
  0x84   : > { %vm1663_vm8 = vmand %vm781_vm14, %vm828_vm4  ;;  %vm2368_vm14 = vcmp.eq.f32.partialorder %v1553_v26, %v1559_v48 }
  0x85   : > { %vm1673_vm7 = vmand %vm782_vm1, %vm829_vm13 }
  0x86   : > { %vm1683_vm6 = vmand %vm783_vm15, %vm830_vm2 }
  0x87   : > { %vm1693_vm1 = vmand %vm2368_vm14, %vm831_vm0  ;;  %v2414_v36 = vsel %vm1683_vm6, -inf, %v1546_v21 }
  0x88   : > { %v2370_v43 = vsel %vm1693_vm1, 4294967295, %v2369_v43  ;;  %vm2373_vm10 = vmmov %vm2372_vm3 }
  0x89   : > { %2371 = vst [vmem:[#allocation6_spill] sm:$0xff] %v2370_v43  ;;  %vm2374_vm2 = vmmov %vm2372_vm3 }
  0x8a   : > { %vm2375_vm0 = vmmov %vm2374_vm2 }
  0xaa   : > { %v1706_v47 = vpop.xlane.xlu0 %272  ;;  %v1708_v49 = vpop.xlane.xlu1 %278 }
  0xab   : > { %vm295_vm15 = vcmp.eq.f32.partialorder %v1366_v0, %v1706_v47  ;;  %vm297_vm9 = vcmp.eq.f32.partialorder %v1369_v1, %v1708_v49 }
  0xac   : > { %v303_v50 = vsel %vm295_vm15, %v1704_v46, 64  ;;  %v305_v25 = vsel %vm297_vm9, %v1704_v46, 64 }
  0xad   : > { %v311_v51 = vsel %vm2372_vm3, %v303_v50, 2147483647  ;;  %v341_v52 = vsel %vm2373_vm10, %v305_v25, 2147483647  ;;  %vm2376_vm10 = vmmov %vm2375_vm0 }
  0xae   : > { %v1724_v53 = vpop.xlane.xlu0 %275  ;;  %v1726_v54 = vpop.xlane.xlu1 %281  ;;  %v313_v55 = vshra.s32 %v311_v51, 16  ;;  %v343_v56 = vshra.s32 %v341_v52, 16  ;;  %v312_v45 = vand.u32 65535, %v311_v51  ;;  %v342_v37 = vand.u32 65535, %v341_v52 }
  0xaf   : > { %vm296_vm4 = vcmp.eq.f32.partialorder %v1372_v2, %v1724_v53  ;;  %vm298_vm13 = vcmp.eq.f32.partialorder %v1379_v5, %v1726_v54 }
  0xb0   : > { %v304_v57 = vsel %vm296_vm4, %v1704_v46, 64  ;;  %v306_v58 = vsel %vm298_vm13, %v1704_v46, 64  ;;  %v315_v59 = vcvt.s32.f32 %v313_v55  ;;  %v345_v3 = vcvt.s32.f32 %v343_v56 }
  0xb1   : > { %v326_v60 = vsel %vm2374_vm2, %v304_v57, 2147483647  ;;  %v356_v61 = vsel %vm2375_vm0, %v306_v58, 2147483647  ;;  %vm2377_vm2 = vmmov %vm2375_vm0  ;;  %v314_v42 = vcvt.s32.f32 %v312_v45  ;;  %v344_v32 = vcvt.s32.f32 %v342_v37 }
  0xb2   : > { %316 = vmin.xlane.f32.xlu0 %v315_v59  ;;  %v1742_v62 = vpop.xlane.xlu0 %284  ;;  %v1744_v63 = vpop.xlane.xlu1 %287  ;;  %v328_v4 = vshra.s32 %v326_v60, 16  ;;  %v358_v8 = vshra.s32 %v356_v61, 16  ;;  %v327_v40 = vand.u32 65535, %v326_v60 }
  0xb3   : > { %vm2340_vm14 = vcmp.eq.f32.partialorder %v1382_v6, %v1742_v62  ;;  %vm2335_vm3 = vcmp.eq.f32.partialorder %v1385_v7, %v1744_v63 }
  0xb4   : > { %v307_v15 = vsel %vm2340_vm14, %v1704_v46, 64  ;;  %v308_v17 = vsel %vm2335_vm3, %v1704_v46, 64  ;;  %v330_v19 = vcvt.s32.f32 %v328_v4  ;;  %v360_v28 = vcvt.s32.f32 %v358_v8 }
  0xb5   : > { %v371_v20 = vsel %vm2376_vm10, %v307_v15, 2147483647  ;;  %v386_v22 = vsel %vm2377_vm2, %v308_v17, 2147483647  ;;  %vm2378_vm10 = vmmov %vm2377_vm2  ;;  %v329_v35 = vcvt.s32.f32 %v327_v40 }
  0xb6   : > { %346 = vmin.xlane.f32.xlu0 %v345_v3  ;;  %331 = vmin.xlane.f32.xlu1 %v330_v19  ;;  %v1760_v23 = vpop.xlane.xlu0 %290  ;;  %v1762_v24 = vpop.xlane.xlu1 %293  ;;  %v373_v29 = vshra.s32 %v371_v20, 16  ;;  %v388_v38 = vshra.s32 %v386_v22, 16  ;;  %v372_v26 = vand.u32 65535, %v371_v20  ;;  %v387_v52 = vand.u32 65535, %v386_v22 }
  0xb7   : > { %vm2339_vm0 = vcmp.eq.f32.partialorder %v1396_v12, %v1760_v23  ;;  %vm2336_vm3 = vcmp.eq.f32.partialorder %v1399_v13, %v1762_v24 }
  0xb8   : > { %v309_v50 = vsel %vm2339_vm0, %v1704_v46, 64  ;;  %v310_v25 = vsel %vm2336_vm3, %v1704_v46, 64  ;;  %v375_v55 = vcvt.s32.f32 %v373_v29  ;;  %v390_v58 = vcvt.s32.f32 %v388_v38 }
  0xb9   : > { %v401_v56 = vsel %vm2378_vm10, %v309_v50, 2147483647  ;;  %v416_v57 = vsel %vm2377_vm2, %v310_v25, 2147483647  ;;  %v357_v38 = vand.u32 65535, %v356_v61  ;;  %v374_v60 = vcvt.s32.f32 %v372_v26 }
  0xba   : > { %361 = vmin.xlane.f32.xlu1 %v360_v28  ;;  %376 = vmin.xlane.f32.xlu0 %v375_v55  ;;  %v403_v4 = vshra.s32 %v401_v56, 16  ;;  %v418_v8 = vshra.s32 %v416_v57, 16  ;;  %v389_v61 = vcvt.s32.f32 %v387_v52 }
  0xbb   : > { %v359_v45 = vcvt.s32.f32 %v357_v38 }
  0xbc   : > { %v405_v15 = vcvt.s32.f32 %v403_v4  ;;  %v420_v17 = vcvt.s32.f32 %v418_v8 }
  0xbe   : > { %391 = vmin.xlane.f32.xlu1 %v390_v58  ;;  %406 = vmin.xlane.f32.xlu0 %v405_v15 }
  0xc2   : > { %421 = vmin.xlane.f32.xlu1 %v420_v17 }
 0x13f   : > { %v317_v44 = vpop.xlane.xlu0 %316 }
 0x140   : > { %vm318_vm3 = vcmp.eq.f32.partialorder %v315_v59, %v317_v44  ;;  %v402_v59 = vand.u32 65535, %v401_v56  ;;  %v323_v22 = vcvt.f32.s32 %v317_v44 }
 0x141   : > { %v319_v29 = vsel %vm318_vm3, %v314_v42, inf }
 0x142   : > { %320 = vmin.xlane.f32.xlu0 %v319_v29  ;;  %v324_v56 = vshll.u32 %v323_v22, 16 }
 0x143   : > { %v332_v50 = vpop.xlane.xlu1 %331  ;;  %v347_v25 = vpop.xlane.xlu0 %346 }
 0x144   : > { %vm333_vm10 = vcmp.eq.f32.partialorder %v330_v19, %v332_v50  ;;  %vm348_vm2 = vcmp.eq.f32.partialorder %v345_v3, %v347_v25  ;;  %v404_v3 = vcvt.s32.f32 %v402_v59  ;;  %v353_v38 = vcvt.f32.s32 %v347_v25 }
 0x145   : > { %v334_v4 = vsel %vm333_vm10, %v329_v35, inf  ;;  %v349_v43 = vsel %vm348_vm2, %v344_v32, inf  ;;  %v417_v35 = vand.u32 65535, %v416_v57 }
 0x146   : > { %335 = vmin.xlane.f32.xlu1 %v334_v4  ;;  %350 = vmin.xlane.f32.xlu0 %v349_v43  ;;  %v354_v59 = vshll.u32 %v353_v38, 16 }
 0x147   : > { %v362_v51 = vpop.xlane.xlu1 %361  ;;  %v377_v8 = vpop.xlane.xlu0 %376  ;;  %v419_v19 = vcvt.s32.f32 %v417_v35 }
 0x148   : > { %vm363_vm3 = vcmp.eq.f32.partialorder %v360_v28, %v362_v51  ;;  %vm378_vm0 = vcmp.eq.f32.partialorder %v375_v55, %v377_v8  ;;  %v338_v28 = vcvt.f32.s32 %v332_v50  ;;  %v368_v57 = vcvt.f32.s32 %v362_v51 }
 0x149   : > { %v364_v42 = vsel %vm363_vm3, %v359_v45, inf  ;;  %v379_v29 = vsel %vm378_vm0, %v374_v60, inf  ;;  %vm2379_vm3 = vcmask 523264  }
 0x14a   : > { %365 = vmin.xlane.f32.xlu1 %v364_v42  ;;  %380 = vmin.xlane.f32.xlu0 %v379_v29  ;;  %v339_v60 = vshll.u32 %v338_v28, 16 }
 0x14b   : > { %v392_v37 = vpop.xlane.xlu1 %391  ;;  %v407_v40 = vpop.xlane.xlu0 %406 }
 0x14c   : > { %vm393_vm10 = vcmp.eq.f32.partialorder %v390_v58, %v392_v37  ;;  %vm408_vm2 = vcmp.eq.f32.partialorder %v405_v15, %v407_v40  ;;  %v383_v58 = vcvt.f32.s32 %v377_v8  ;;  %v398_v44 = vcvt.f32.s32 %v392_v37 }
 0x14d   : > { %v394_v32 = vsel %vm393_vm10, %v389_v61, inf  ;;  %v409_v43 = vsel %vm408_vm2, %v404_v3, inf  ;;  %v369_v61 = vshll.u32 %v368_v57, 16  ;;  %v413_v8 = vcvt.f32.s32 %v407_v40 }
 0x14e   : > { %395 = vmin.xlane.f32.xlu1 %v394_v32  ;;  %410 = vmin.xlane.f32.xlu0 %v409_v43  ;;  %v384_v51 = vshll.u32 %v383_v58, 16 }
 0x14f   : > { %v422_v26 = vpop.xlane.xlu1 %421 }
 0x150   : > { %vm423_vm14 = vcmp.eq.f32.partialorder %v420_v17, %v422_v26  ;;  %v428_v22 = vcvt.f32.s32 %v422_v26 }
 0x151   : > { %v424_v20 = vsel %vm423_vm14, %v419_v19, inf }
 0x152   : > { %425 = vmin.xlane.f32.xlu1 %v424_v20  ;;  %v414_v20 = vshll.u32 %v413_v8, 16 }
 0x1cf   : > { %v321_v55 = vpop.xlane.xlu0 %320 }
 0x1d0   : > { %v322_v4 = vcvt.f32.s32 %v321_v55 }
 0x1d2   : > { %v325_v45 = vadd.s32 %v324_v56, %v322_v4 }
 0x1d3   : > { %v336_v15 = vpop.xlane.xlu1 %335  ;;  %v351_v52 = vpop.xlane.xlu0 %350 }
 0x1d4   : > { %vm431_vm0 = vcmp.eq.s32.totalorder %v1704_v46, %v325_v45  ;;  %v337_v42 = vcvt.f32.s32 %v336_v15  ;;  %v352_v29 = vcvt.f32.s32 %v351_v52  ;;  %v429_v45 = vshll.u32 %v428_v22, 16 }
 0x1d5   : > { %vm439_vm14 = vmand %vm295_vm15, %vm431_vm0 }
 0x1d6   : > { %v340_v17 = vadd.s32 %v339_v60, %v337_v42  ;;  %v355_v50 = vadd.s32 %v354_v59, %v352_v29  ;;  %v1783_v25 = vsel %vm439_vm14, -inf, %v1366_v0  ;;  %v399_v0 = vshll.u32 %v398_v44, 16  ;;  %vm2380_vm14 = vmmov %vm2379_vm3 }
 0x1d7   : > { %v366_v3 = vpop.xlane.xlu1 %365  ;;  %v381_v35 = vpop.xlane.xlu0 %380  ;;  %v455_v32 = vsel %vm2379_vm3, %v1783_v25, -inf }
 0x1d8   : > { %vm432_vm10 = vcmp.eq.s32.totalorder %v1704_v46, %v340_v17  ;;  %vm433_vm2 = vcmp.eq.s32.totalorder %v1704_v46, %v355_v50  ;;  %v367_v47 = vcvt.f32.s32 %v366_v3  ;;  %v382_v43 = vcvt.f32.s32 %v381_v35  ;;  %456 = vmax.xlane.f32.xlu0 %v455_v32 }
 0x1d9   : > { %vm440_vm15 = vmand %vm296_vm4, %vm432_vm10 }
 0x1da   : > { %v370_v37 = vadd.s32 %v369_v61, %v367_v47  ;;  %v385_v19 = vadd.s32 %v384_v51, %v382_v43  ;;  %v1793_v40 = vsel %vm440_vm15, -inf, %v1372_v2  ;;  %vm441_vm0 = vmand %vm297_vm9, %vm433_vm2  ;;  %vm2382_vm2 = vcmp.eq.f32.partialorder %v1382_v6, %v1742_v62 }
 0x1db   : > { %v396_v28 = vpop.xlane.xlu1 %395  ;;  %v411_v55 = vpop.xlane.xlu0 %410  ;;  %v458_v56 = vsel %vm2380_vm14, %v1793_v40, -inf  ;;  %v1801_v53 = vsel %vm441_vm0, -inf, %v1369_v1  ;;  %vm2381_vm10 = vmmov %vm2380_vm14 }
 0x1dc   : > { %vm434_vm4 = vcmp.eq.s32.totalorder %v1704_v46, %v370_v37  ;;  %vm435_vm3 = vcmp.eq.s32.totalorder %v1704_v46, %v385_v19  ;;  %v397_v2 = vcvt.f32.s32 %v396_v28  ;;  %v412_v38 = vcvt.f32.s32 %v411_v55  ;;  %459 = vmax.xlane.f32.xlu1 %v458_v56  ;;  %vm2383_vm0 = vmmov %vm2381_vm10 }
 0x1dd   : > { %v461_v49 = vsel %vm2381_vm10, %v1801_v53, -inf  ;;  %vm442_vm9 = vmand %vm298_vm13, %vm434_vm4 }
 0x1de   : > { %v400_v26 = vadd.s32 %v399_v0, %v397_v2  ;;  %v415_v4 = vadd.s32 %v414_v20, %v412_v38  ;;  %462 = vmax.xlane.f32.xlu0 %v461_v49  ;;  %v1811_v1 = vsel %vm442_vm9, -inf, %v1379_v5  ;;  %vm443_vm15 = vmand %vm2382_vm2, %vm435_vm3  ;;  %vm2385_vm3 = vcmp.eq.f32.partialorder %v1385_v7, %v1744_v63 }
 0x1df   : > { %v426_v60 = vpop.xlane.xlu1 %425  ;;  %v464_v57 = vsel %vm2383_vm0, %v1811_v1, -inf  ;;  %v1819_v58 = vsel %vm443_vm15, -inf, %v1382_v6  ;;  %vm2384_vm4 = vmmov %vm2383_vm0  ;;  %vm2386_vm9 = vcmp.eq.f32.partialorder %v1396_v12, %v1760_v23 }
 0x1e0   : > { %vm436_vm13 = vcmp.eq.s32.totalorder %v1704_v46, %v400_v26  ;;  %vm437_vm14 = vcmp.eq.s32.totalorder %v1704_v46, %v415_v4  ;;  %v427_v54 = vcvt.f32.s32 %v426_v60  ;;  %465 = vmax.xlane.f32.xlu1 %v464_v57  ;;  %v467_v5 = vsel %vm2384_vm4, %v1819_v58, -inf  ;;  %vm2387_vm15 = vmmov %vm2383_vm0 }
 0x1e1   : > { %vm444_vm10 = vmand %vm2385_vm3, %vm436_vm13 }
 0x1e2   : > { %v430_v62 = vadd.s32 %v429_v45, %v427_v54  ;;  %468 = vmax.xlane.f32.xlu0 %v467_v5  ;;  %v1829_v15 = vsel %vm444_vm10, -inf, %v1385_v7  ;;  %vm445_vm2 = vmand %vm2386_vm9, %vm437_vm14 }
 0x1e3   : > { %v470_v6 = vsel %vm2387_vm15, %v1829_v15, -inf  ;;  %v1837_v52 = vsel %vm445_vm2, -inf, %v1396_v12  ;;  %vm2388_vm13 = vmmov %vm2384_vm4  ;;  %vm2389_vm4 = vcmp.eq.f32.partialorder %v1399_v13, %v1762_v24 }
 0x1e4   : > { %vm438_vm0 = vcmp.eq.s32.totalorder %v1704_v46, %v430_v62  ;;  %471 = vmax.xlane.f32.xlu1 %v470_v6  ;;  %v473_v63 = vsel %vm2388_vm13, %v1837_v52, -inf  ;;  %vm2390_vm14 = vmmov %vm2388_vm13 }
 0x1e5   : > { %vm446_vm3 = vmand %vm2389_vm4, %vm438_vm0 }
 0x1e6   : > { %474 = vmax.xlane.f32.xlu0 %v473_v63  ;;  %v1846_v7 = vsel %vm446_vm3, -inf, %v1399_v13  ;;  %vm2391_vm9 = vmmov %vm2388_vm13 }
 0x1e7   : > { %v476_v23 = vsel %vm2390_vm14, %v1846_v7, -inf  ;;  %vm2392_vm15 = vmmov %vm2391_vm9 }
 0x1e8   : > { %477 = vmax.xlane.f32.xlu1 %v476_v23  ;;  %vm2393_vm13 = vmmov %vm2391_vm9 }
 0x1e9   : > { %vm2394_vm3 = vmmov %vm2391_vm9 }
 0x265   : > { %v1850_v12 = vpop.xlane.xlu0 %456 }
 0x266   : > { %vm479_vm10 = vcmp.eq.f32.partialorder %v1783_v25, %v1850_v12  ;;  %v2406_v12 = vsel %vm1643_vm11, -inf, %v1513_v11 }
 0x267   : > { %v487_v59 = vsel %vm479_vm10, %v1704_v46, 64 }
 0x268   : > { %v495_v24 = vsel %vm2391_vm9, %v487_v59, 2147483647  ;;  %vm2395_vm9 = vmmov %vm2394_vm3 }
 0x269   : > { %v1859_v42 = vpop.xlane.xlu1 %459  ;;  %v497_v13 = vshra.s32 %v495_v24, 16 }
 0x26a   : > { %vm480_vm2 = vcmp.eq.f32.partialorder %v1793_v40, %v1859_v42 }
 0x26b   : > { %v488_v29 = vsel %vm480_vm2, %v1704_v46, 64  ;;  %v1867_v44 = vpop.xlane.xlu0 %462  ;;  %v499_v17 = vcvt.s32.f32 %v497_v13  ;;  %v496_v13 = vand.u32 65535, %v495_v24 }
 0x26c   : > { %v510_v50 = vsel %vm2392_vm15, %v488_v29, 2147483647  ;;  %vm481_vm0 = vcmp.eq.f32.partialorder %v1801_v53, %v1867_v44 }
 0x26d   : > { %v489_v61 = vsel %vm481_vm0, %v1704_v46, 64  ;;  %v1876_v51 = vpop.xlane.xlu1 %465  ;;  %500 = vmin.xlane.f32.xlu0 %v499_v17  ;;  %v512_v8 = vshra.s32 %v510_v50, 16 }
 0x26e   : > { %v525_v3 = vsel %vm2393_vm13, %v489_v61, 2147483647  ;;  %vm482_vm4 = vcmp.eq.f32.partialorder %v1811_v1, %v1876_v51  ;;  %vm2396_vm13 = vmmov %vm2394_vm3  ;;  %v498_v61 = vcvt.s32.f32 %v496_v13 }
 0x26f   : > { %v490_v35 = vsel %vm482_vm4, %v1704_v46, 64  ;;  %v1885_v32 = vpop.xlane.xlu0 %468  ;;  %v514_v47 = vcvt.s32.f32 %v512_v8  ;;  %v527_v43 = vshra.s32 %v525_v3, 16  ;;  %v511_v8 = vand.u32 65535, %v510_v50 }
 0x270   : > { %v540_v0 = vsel %vm2394_vm3, %v490_v35, 2147483647  ;;  %vm2345_vm14 = vcmp.eq.f32.partialorder %v1819_v58, %v1885_v32 }
 0x271   : > { %v491_v37 = vsel %vm2345_vm14, %v1704_v46, 64  ;;  %515 = vmin.xlane.f32.xlu1 %v514_v47  ;;  %v1894_v19 = vpop.xlane.xlu1 %471  ;;  %v529_v20 = vcvt.s32.f32 %v527_v43  ;;  %v542_v22 = vshra.s32 %v540_v0, 16  ;;  %v526_v43 = vand.u32 65535, %v525_v3 }
 0x272   : > { %v555_v28 = vsel %vm2395_vm9, %v491_v37, 2147483647  ;;  %vm2341_vm15 = vcmp.eq.f32.partialorder %v1829_v15, %v1894_v19 }
 0x273   : > { %v492_v55 = vsel %vm2341_vm15, %v1704_v46, 64  ;;  %530 = vmin.xlane.f32.xlu0 %v529_v20  ;;  %v1903_v56 = vpop.xlane.xlu0 %474  ;;  %v544_v2 = vcvt.s32.f32 %v542_v22  ;;  %v557_v38 = vshra.s32 %v555_v28, 16  ;;  %v513_v22 = vcvt.s32.f32 %v511_v8 }
 0x274   : > { %v570_v49 = vsel %vm2396_vm13, %v492_v55, 2147483647  ;;  %vm2344_vm3 = vcmp.eq.f32.partialorder %v1837_v52, %v1903_v56  ;;  %vm2398_vm13 = vmmov %vm2395_vm9  ;;  %v541_v55 = vand.u32 65535, %v540_v0 }
 0x275   : > { %v493_v26 = vsel %vm2344_vm3, %v1704_v46, 64  ;;  %545 = vmin.xlane.f32.xlu1 %v544_v2  ;;  %v1912_v4 = vpop.xlane.xlu1 %477  ;;  %v559_v45 = vcvt.s32.f32 %v557_v38  ;;  %v572_v60 = vshra.s32 %v570_v49, 16 }
 0x276   : > { %2397 = vst [vmem:[#allocation7_spill] sm:$0xff] %v1912_v4  ;;  %v585_v57 = vsel %vm2395_vm9, %v493_v26, 2147483647  ;;  %vm2342_vm15 = vcmp.eq.f32.partialorder %v1846_v7, %v1912_v4  ;;  %v543_v24 = vcvt.s32.f32 %v541_v55  ;;  %v571_v4 = vand.u32 65535, %v570_v49 }
 0x277   : > { %v494_v54 = vsel %vm2342_vm15, %v1704_v46, 64  ;;  %560 = vmin.xlane.f32.xlu0 %v559_v45  ;;  %v574_v5 = vcvt.s32.f32 %v572_v60  ;;  %v587_v62 = vshra.s32 %v585_v57, 16  ;;  %v528_v60 = vcvt.s32.f32 %v526_v43 }
 0x278   : > { %v600_v6 = vsel %vm2398_vm13, %v494_v54, 2147483647  ;;  %v556_v54 = vand.u32 65535, %v555_v28  ;;  %v586_v13 = vand.u32 65535, %v585_v57 }
 0x279   : > { %575 = vmin.xlane.f32.xlu1 %v574_v5  ;;  %v589_v63 = vcvt.s32.f32 %v587_v62  ;;  %v602_v23 = vshra.s32 %v600_v6, 16  ;;  %v601_v8 = vand.u32 65535, %v600_v6 }
 0x27a   : > { %v558_v3 = vcvt.s32.f32 %v556_v54 }
 0x27b   : > { %590 = vmin.xlane.f32.xlu0 %v589_v63  ;;  %v604_v59 = vcvt.s32.f32 %v602_v23  ;;  %v603_v43 = vcvt.s32.f32 %v601_v8 }
 0x27d   : > { %605 = vmin.xlane.f32.xlu1 %v604_v59 }
 0x2fa   : > { %v501_v29 = vpop.xlane.xlu0 %500 }
 0x2fb   : > { %vm502_vm9 = vcmp.eq.f32.partialorder %v499_v17, %v501_v29  ;;  %v507_v57 = vcvt.f32.s32 %v501_v29 }
 0x2fc   : > { %v503_v35 = vsel %vm502_vm9, %v498_v61, inf  ;;  %v573_v61 = vcvt.s32.f32 %v571_v4  ;;  %v1276_v4 = vmov 0  }
 0x2fd   : > { %504 = vmin.xlane.f32.xlu0 %v503_v35  ;;  %v588_v35 = vcvt.s32.f32 %v586_v13  ;;  %1187 = vset.pattern.permute.xlu1 %v1276_v4 }
 0x2fe   : > { %v516_v37 = vpop.xlane.xlu1 %515  ;;  %1186 = vset.pattern.permute.xlu0 %v1276_v4 }
 0x2ff   : > { %vm517_vm15 = vcmp.eq.f32.partialorder %v514_v47, %v516_v37 }
 0x300   : > { %v531_v38 = vpop.xlane.xlu0 %530  ;;  %v518_v26 = vsel %vm517_vm15, %v513_v22, inf }
 0x301   : > { %519 = vmin.xlane.f32.xlu1 %v518_v26  ;;  %vm532_vm13 = vcmp.eq.f32.partialorder %v529_v20, %v531_v38  ;;  %v537_v22 = vcvt.f32.s32 %v531_v38 }
 0x302   : > { %v533_v62 = vsel %vm532_vm13, %v528_v60, inf  ;;  %v546_v23 = vpop.xlane.xlu1 %545 }
 0x303   : > { %534 = vmin.xlane.f32.xlu0 %v533_v62  ;;  %vm547_vm3 = vcmp.eq.f32.partialorder %v544_v2, %v546_v23  ;;  %v552_v26 = vcvt.f32.s32 %v546_v23 }
 0x304   : > { %v561_v17 = vpop.xlane.xlu0 %560  ;;  %v548_v50 = vsel %vm547_vm3, %v543_v24, inf }
 0x305   : > { %549 = vmin.xlane.f32.xlu1 %v548_v50  ;;  %vm562_vm9 = vcmp.eq.f32.partialorder %v559_v45, %v561_v17  ;;  %v567_v60 = vcvt.f32.s32 %v561_v17  ;;  %v538_v50 = vshll.u32 %v537_v22, 16 }
 0x306   : > { %v563_v0 = vsel %vm562_vm9, %v558_v3, inf  ;;  %v576_v47 = vpop.xlane.xlu1 %575  ;;  %vm824_vm9 = vcmp.eq.s32.totalorder %v1406_v27, %v1617_v33  ;;  %v553_v3 = vshll.u32 %v552_v26, 16 }
 0x307   : > { %564 = vmin.xlane.f32.xlu0 %v563_v0  ;;  %vm577_vm15 = vcmp.eq.f32.partialorder %v574_v5, %v576_v47  ;;  %v582_v54 = vcvt.f32.s32 %v576_v47  ;;  %v568_v13 = vshll.u32 %v567_v60, 16 }
 0x308   : > { %v1922_v28 = vpop.xlane.xlu0 %590  ;;  %v578_v20 = vsel %vm577_vm15, %v573_v61, inf  ;;  %vm2399_vm15 = vcmp.eq.f32.partialorder %v1499_v9, %v1559_v48 }
 0x309   : > { %579 = vmin.xlane.f32.xlu1 %v578_v20  ;;  %vm592_vm13 = vcmp.eq.f32.partialorder %v589_v63, %v1922_v28  ;;  %v508_v63 = vshll.u32 %v507_v57, 16  ;;  %v583_v0 = vshll.u32 %v582_v54, 16  ;;  %v2404_v20 = vsel %vm1636_vm5, -inf, %v1506_v10  ;;  %v1205_v57 = vld [vmem:[%s1363_s30 + $0x8] sm:$0xff] }
 0x30a   : > { %v593_v2 = vsel %vm592_vm13, %v588_v35, inf  ;;  %v1925_v49 = vpop.xlane.xlu1 %605  ;;  %vm1935_vm13 = vmand %vm2399_vm15, %vm824_vm9  ;;  %vm2402_vm15 = vcmask 523264   ;;  %v2410_v10 = vsel %vm1663_vm8, -inf, %v1528_v16 }
 0x30b   : > { %594 = vmin.xlane.f32.xlu0 %v593_v2  ;;  %vm607_vm3 = vcmp.eq.f32.partialorder %v604_v59, %v1925_v49  ;;  %v522_v59 = vcvt.f32.s32 %v516_v37  ;;  %v840_v33 = vsel %vm1935_vm13, -inf, %v1499_v9  ;;  %v597_v37 = vcvt.f32.s32 %v1922_v28  ;;  %vm2403_vm13 = vmmov %vm2402_vm15 }
 0x30c   : > { %v608_v45 = vsel %vm607_vm3, %v603_v43, inf  ;;  %v848_v47 = vsel %vm2402_vm15, %v840_v33, -inf  ;;  %vm2405_vm14 = vmmov %vm2403_vm13 }
 0x30d   : > { %609 = vmin.xlane.f32.xlu1 %v608_v45  ;;  %v523_v24 = vshll.u32 %v522_v59, 16  ;;  %v849_v28 = vsel %vm2405_vm14, %v2404_v20, -inf  ;;  %v923_v20 = vld [vmem:[%s2026_s7 + $0x30] sm:$0xff] }
 0x38a   : > { %v505_v5 = vpop.xlane.xlu0 %504 }
 0x38b   : > { %v506_v55 = vcvt.f32.s32 %v505_v5  ;;  %v2417_v5 = vld [vmem:[#allocation5_spill] sm:$0xff] }
 0x38c   : > { %v2418_v6 = vsel %vm1693_vm1, -inf, %v2417_v5  ;;  %v254_v5 = vmul.f32 1.442695, %v1205_v57 }
 0x38d   : > { %v509_v62 = vadd.s32 %v508_v63, %v506_v55 }
 0x38e   : > { %v520_v29 = vpop.xlane.xlu1 %519 }
 0x38f   : > { %v521_v48 = vcvt.f32.s32 %v520_v29  ;;  %vm615_vm3 = vcmp.eq.s32.totalorder %v1704_v46, %v509_v62 }
 0x390   : > { %v535_v38 = vpop.xlane.xlu0 %534  ;;  %vm623_vm9 = vmand %vm479_vm10, %vm615_vm3 }
 0x391   : > { %v524_v23 = vadd.s32 %v523_v24, %v521_v48  ;;  %v536_v17 = vcvt.f32.s32 %v535_v38  ;;  %v631_v9 = vsel %vm623_vm9, -inf, %v1783_v25  ;;  %vm2407_vm10 = vmmov %vm2403_vm13  ;;  %v2408_v25 = vsel %vm1653_vm12, -inf, %v1520_v14  ;;  %v920_v38 = vld [vmem:[%s2026_s7 + $0x18] sm:$0xff] }
 0x392   : > { %v550_v61 = vpop.xlane.xlu1 %549  ;;  %v639_v8 = vsel %vm2403_vm13, %v631_v9, -inf  ;;  %v850_v35 = vsel %vm2407_vm10, %v2406_v12, -inf  ;;  %vm2409_vm3 = vmmov %vm2407_vm10  ;;  %v2412_v14 = vsel %vm1673_vm7, -inf, %v1536_v18 }
 0x393   : > { %v851_v2 = vsel %vm2409_vm3, %v2408_v25, -inf  ;;  %v539_v43 = vadd.s32 %v538_v50, %v536_v17  ;;  %v551_v45 = vcvt.f32.s32 %v550_v61  ;;  %640 = vmax.xlane.f32.xlu0 %v639_v8  ;;  %vm616_vm9 = vcmp.eq.s32.totalorder %v1704_v46, %v524_v23  ;;  %vm2411_vm5 = vmmov %vm2409_vm3  ;;  %v921_v17 = vld [vmem:[%s2026_s7 + $0x20] sm:$0xff]  ;;  %v922_v61 = vld [vmem:[%s2026_s7 + $0x28] sm:$0xff] }
 0x394   : > { %v852_v30 = vsel %vm2411_vm5, %v2410_v10, -inf  ;;  %v565_v11 = vpop.xlane.xlu0 %564  ;;  %vm624_vm11 = vmand %vm480_vm2, %vm616_vm9  ;;  %v612_v25 = vcvt.f32.s32 %v1925_v49  ;;  %v2429_v10 = vld [vmem:[#allocation7_spill] sm:$0xff] }
 0x395   : > { %v853_v31 = vmax.f32 %v848_v47, %v852_v30  ;;  %vm2413_vm12 = vmmov %vm2409_vm3  ;;  %v554_v63 = vadd.s32 %v553_v3, %v551_v45  ;;  %v566_v59 = vcvt.f32.s32 %v565_v11  ;;  %v632_v39 = vsel %vm624_vm11, -inf, %v1793_v40 }
 0x396   : > { %v854_v34 = vsel %vm2413_vm12, %v2412_v14, -inf  ;;  %vm2415_vm14 = vmmov %vm2409_vm3  ;;  %vm617_vm7 = vcmp.eq.s32.totalorder %v1704_v46, %v539_v43  ;;  %v580_v18 = vpop.xlane.xlu1 %579  ;;  %v598_v40 = vshll.u32 %v597_v37, 16  ;;  %vm2425_vm11 = vcmp.eq.f32.partialorder %v1829_v15, %v1894_v19  ;;  %v919_v19 = vld [vmem:[%s2026_s7 + $0x10] sm:$0xff] }
 0x397   : > { %v856_v16 = vsel %vm2415_vm14, %v2414_v36, -inf  ;;  %vm2419_vm8 = vmmov %vm2409_vm3  ;;  %v855_v21 = vmax.f32 %v849_v28, %v854_v34  ;;  %v569_v26 = vadd.s32 %v568_v13, %v566_v59  ;;  %v581_v60 = vcvt.f32.s32 %v580_v18  ;;  %v2056_v18 = vld [vmem:[%s1363_s30 + $0x20] sm:$0xff] }
 0x398   : > { %v858_v42 = vsel %vm2419_vm8, %v2418_v6, -inf  ;;  %vm2420_vm2 = vmmov %vm2409_vm3  ;;  %v857_v41 = vmax.f32 %v850_v35, %v856_v16  ;;  %vm618_vm1 = vcmp.eq.s32.totalorder %v1704_v46, %v554_v63  ;;  %v595_v62 = vpop.xlane.xlu0 %594  ;;  %vm2423_vm3 = vcmp.eq.f32.partialorder %v1819_v58, %v1885_v32  ;;  %v1206_v6 = vld [vmem:[%s1363_s30 + $0x10] sm:$0xff]  ;;  %v1207_v63 = vld [vmem:[%s1363_s30 + $0x18] sm:$0xff] }
 0x399   : > { %v642_v22 = vsel %vm2420_vm2, %v632_v39, -inf  ;;  %vm625_vm6 = vmand %vm481_vm0, %vm617_vm7  ;;  %v859_v55 = vmax.f32 %v851_v2, %v858_v42  ;;  %v860_v44 = vmax.f32 %v853_v31, %v855_v21  ;;  %v584_v24 = vadd.s32 %v583_v0, %v581_v60  ;;  %v924_v31 = vld [vmem:[%s2026_s7 + $0x38] sm:$0xff] }
 0x39a   : > { %643 = vmax.xlane.f32.xlu1 %v642_v22  ;;  %v633_v54 = vsel %vm625_vm6, -inf, %v1801_v53  ;;  %vm2421_vm15 = vmmov %vm2420_vm2  ;;  %v596_v50 = vcvt.f32.s32 %v595_v62  ;;  %vm619_vm0 = vcmp.eq.s32.totalorder %v1704_v46, %v569_v26  ;;  %vm2427_vm7 = vcmp.eq.f32.partialorder %v1837_v52, %v1903_v56  ;;  %v917_v56 = vld [vmem:[%s2026_s7] sm:$0xff]  ;;  %v610_v35 = vpop.xlane.xlu1 %609 }
 0x39b   : > { %v645_v33 = vsel %vm2421_vm15, %v633_v54, -inf  ;;  %vm626_vm13 = vmand %vm482_vm4, %vm618_vm1  ;;  %v861_v29 = vmax.f32 %v857_v41, %v859_v55  ;;  %vm620_vm4 = vcmp.eq.s32.totalorder %v1704_v46, %v584_v24  ;;  %vm927_vm15 = vcmp.gt.f32.partialorder %v919_v19, 0.5  ;;  %v2066_v55 = vld [vmem:[%s1363_s30 + $0x28] sm:$0xff]  ;;  %v933_v54 = vld [vmem:[%s240_s10] sm:$0x1] }
 0x39c   : > { %646 = vmax.xlane.f32.xlu0 %v645_v33  ;;  %v634_v48 = vsel %vm626_vm13, -inf, %v1811_v1  ;;  %vm2422_vm10 = vmmov %vm2420_vm2  ;;  %v599_v13 = vadd.s32 %v598_v40, %v596_v50  ;;  %v937_v23 = vsel %vm927_vm15, 1, %v1276_v4  ;;  %vm925_vm13 = vcmp.gt.f32.partialorder %v917_v56, 0.5 }
 0x39d   : > { %v648_v53 = vsel %vm2422_vm10, %v634_v48, -inf  ;;  %vm627_vm9 = vmand %vm2423_vm3, %vm619_vm0  ;;  %v862_v3 = vmax.f32 %v860_v44, %v861_v29  ;;  %vm928_vm0 = vcmp.gt.f32.partialorder %v920_v38, 0.5  ;;  %v935_v9 = vsel %vm925_vm13, 1, %v1276_v4  ;;  %v2077_v29 = vld [vmem:[%s1363_s30 + $0x30] sm:$0xff] }
 0x39e   : > { %649 = vmax.xlane.f32.xlu1 %v648_v53  ;;  %v635_v51 = vsel %vm627_vm9, -inf, %v1819_v58  ;;  %vm2424_vm5 = vmmov %vm2420_vm2  ;;  %vm621_vm14 = vcmp.eq.s32.totalorder %v1704_v46, %v599_v13  ;;  %v938_v47 = vsel %vm928_vm0, 1, %v1276_v4  ;;  %vm929_vm10 = vcmp.gt.f32.partialorder %v921_v17, 0.5 }
 0x39f   : > { %v651_v0 = vsel %vm2424_vm5, %v635_v51, -inf  ;;  %vm628_vm12 = vmand %vm2425_vm11, %vm620_vm4  ;;  %v939_v8 = vsel %vm929_vm10, 1, %v1276_v4  ;;  %vm930_vm3 = vcmp.gt.f32.partialorder %v922_v61, 0.5  ;;  %vm931_vm9 = vcmp.gt.f32.partialorder %v923_v20, 0.5 }
 0x3a0   : > { %652 = vmax.xlane.f32.xlu0 %v651_v0  ;;  %v636_v1 = vsel %vm628_vm12, -inf, %v1829_v15  ;;  %vm2426_vm8 = vmmov %vm2420_vm2  ;;  %v918_v15 = vld [vmem:[%s2026_s7 + $0x8] sm:$0xff]  ;;  %v940_v28 = vsel %vm930_vm3, 1, %v1276_v4  ;;  %v941_v12 = vsel %vm931_vm9, 1, %v1276_v4  ;;  %v611_v2 = vcvt.f32.s32 %v610_v35 }
 0x3a1   : > { %v654_v32 = vsel %vm2426_vm8, %v636_v1, -inf  ;;  %vm629_vm2 = vmand %vm2427_vm7, %vm621_vm14  ;;  %vm926_vm1 = vcmp.gt.f32.partialorder %v918_v15, 0.5  ;;  %v613_v43 = vshll.u32 %v612_v25, 16  ;;  %vm932_vm14 = vcmp.gt.f32.partialorder %v924_v31, 0.5 }
 0x3a2   : > { %655 = vmax.xlane.f32.xlu1 %v654_v32  ;;  %v637_v58 = vsel %vm629_vm2, -inf, %v1837_v52  ;;  %vm2428_vm6 = vmmov %vm2424_vm5  ;;  %v936_v52 = vsel %vm926_vm1, 1, %v1276_v4  ;;  %vm2430_vm5 = vcmp.eq.f32.partialorder %v1846_v7, %v2429_v10  ;;  %v942_v49 = vsel %vm932_vm14, 1, %v1276_v4 }
 0x3a3   : > { %v657_v37 = vsel %vm2428_vm6, %v637_v58, -inf  ;;  %v614_v45 = vadd.s32 %v613_v43, %v611_v2  ;;  %vm2431_vm12 = vmmov %vm2428_vm6  ;;  %v863_v14 = vrot.slane %v862_v3, 4  ;;  %v258_v59 = vmul.f32 1.442695, %v1207_v63 }
 0x3a4   : > { %658 = vmax.xlane.f32.xlu0 %v657_v37  ;;  %v260_v22 = vmul.f32 1.442695, %v2056_v18  ;;  %v262_v26 = vmul.f32 1.442695, %v2066_v55  ;;  %vm934_vm2 = vcmp.gt.f32.partialorder %v933_v54, 0.5  ;;  %v978_v50 = vsub.s32 0, %v1406_v27 }
 0x3a5   : > { %vm622_vm4 = vcmp.eq.s32.totalorder %v1704_v46, %v614_v45  ;;  %v864_v34 = vmax.f32 %v862_v3, %v863_v14  ;;  %v1204_v46 = vld [vmem:[%s1363_s30] sm:$0xff]  ;;  %v264_v24 = vmul.f32 1.442695, %v2077_v29  ;;  %v2432_v53 = vmov 0 }
 0x3a6   : > { %vm630_vm11 = vmand %vm2430_vm5, %vm622_vm4  ;;  %v252_v36 = vmul.f32 1.442695, %v1204_v46  ;;  %v975_v13 = vsel %vm934_vm2, 1, %v1276_v4  ;;  %v2438_v4 = vmov 0  ;;  %v2444_v19 = vmov 0 }
 0x3a7   : > { %v638_v30 = vsel %vm630_vm11, -inf, %v1846_v7  ;;  %v865_v16 = vrot.slane %v864_v34, 2  ;;  %v256_v7 = vmul.f32 1.442695, %v1206_v6  ;;  %v2113_v1 = vrot.slane %v975_v13, %v978_v50 }
 0x3a8   : > { %v660_v11 = vsel %vm2431_vm12, %v638_v30, -inf  ;;  %1188 = vpow2.f32 %v252_v36  ;;  %v2448_v17 = vmov 0 }
 0x3a9   : > { %v866_v42 = vmax.f32 %v864_v34, %v865_v16  ;;  %1190 = vpow2.f32 %v254_v5 }
 0x3aa   : > { %1192 = vpow2.f32 %v256_v7  ;;  %v1211_v7 = vld [vmem:[%s1363_s30 + $0x38] sm:$0xff]  ;;  %s1218_s30 = scalar_lea.vmem %s1217_s29, 2048 }
 0x3ab   : > { %v867_v39 = vrot.slane %v866_v42, 1  ;;  %1194 = vpow2.f32 %v258_v59  ;;  %p1220_p1 = scmp.lt.s32.totalorder %s1218_s30, %s1212_s27 }
 0x3ac   : > { %1196 = vpow2.f32 %v260_v22 }
 0x3ad   : > { %v2063_v41 = vmax.f32 %v866_v42, %v867_v39  ;;  %1198 = vpow2.f32 %v262_v26  ;;  %v266_v42 = vmul.f32 1.442695, %v1211_v7  ;;  %p1221_p2 = por %p1220_p1, %p1219_p0 }
 0x3ae   : > { %1200 = vpow2.f32 %v264_v24 }
 0x3af   : > { %vm893_vm7 = vcmp.ge.f32.partialorder %v1204_v46, %v2063_v41  ;;  %vm894_vm1 = vcmp.ge.f32.partialorder %v1205_v57, %v2063_v41  ;;  %vm895_vm13 = vcmp.ge.f32.partialorder %v1206_v6, %v2063_v41  ;;  %vm896_vm14 = vcmp.ge.f32.partialorder %v1207_v63, %v2063_v41  ;;  %p1222_p3 = pnand %p1221_p2, %p1215_p13 }
 0x3b0   : > { %1202 = vpow2.f32 %v266_v42 }
 0x3b2   : > { %v2069_v60 = vpop.eup %1188 }
 0x3b3   : > { %947 = vperm.xlu1 %1187, %v936_v52   ;;  %v1191_v40 = vpop.eup %1190  ;;  %vm869_vm8 = vcmp.gt.f32.partialorder %v2069_v60, 0.05  ;;  %v997_v25 = vmax.f32 %v2069_v60, 1e-37 }
 0x3b4   : > { %v2071_v62 = vpop.eup %1192  ;;  %vm870_vm6 = vcmp.gt.f32.partialorder %v1191_v40, 0.05  ;;  %vm2087_vm10 = vmand %vm893_vm7, %vm869_vm8  ;;  %v998_v56 = vmax.f32 %v1191_v40, 1e-37 }
 0x3b5   : > { %vm871_vm15 = vcmp.gt.f32.partialorder %v2071_v62, 0.05  ;;  %v2083_v48 = vpop.eup %1194  ;;  %v2433_v53 = vsel %vm2087_vm10, 4294967295, %v2432_v53  ;;  %vm2093_vm9 = vmand %vm894_vm1, %vm870_vm6 }
 0x3b6   : > { %vm2099_vm5 = vmand %vm895_vm13, %vm871_vm15  ;;  %v2103_v0 = vpop.eup %1196  ;;  %vm872_vm12 = vcmp.gt.f32.partialorder %v2083_v48, 0.05  ;;  %vm897_vm13 = vcmp.ge.f32.partialorder %v2056_v18, %v2063_v41  ;;  %v1000_v43 = vmax.f32 %v2083_v48, 1e-37 }
 0x3b7   : > { %950 = vperm.xlu1 %1187, %v937_v23   ;;  %vm2129_vm1 = vmand %vm896_vm14, %vm872_vm12  ;;  %v2136_v52 = vpop.eup %1198  ;;  %vm2452_vm10 = vcmp.gt.f32.partialorder %v2103_v0, 0.05  ;;  %v1001_v31 = vmax.f32 %v2103_v0, 1e-37 }
 0x3b8   : > { %v2445_v19 = vsel %vm2129_vm1, 4294967295, %v2444_v19 }
 0x3ba   : > { %944 = vperm.xlu0 %1186, %v935_v9  }
 0x3bb   : > { %953 = vperm.xlu1 %1187, %v938_v47   ;;  %v1201_v47 = vpop.eup %1200 }
 0x3bf   : > { %956 = vperm.xlu1 %1187, %v939_v8   ;;  %v999_v8 = vmax.f32 %v2071_v62, 1e-37 }
 0x3c3   : > { %959 = vperm.xlu1 %1187, %v940_v28   ;;  %v2453_v28 = vmov 0 }
 0x3c7   : > { %962 = vperm.xlu1 %1187, %v941_v12   ;;  %v2456_v12 = vmov 0 }
 0x3eb   : > { %661 = vmax.xlane.f32.xlu1 %v660_v11 }
 0x3fc   : > { %965 = vperm.xlu1 %1187, %v942_v49  }
 0x420   : > { %v641_v21 = vpop.xlane.xlu0 %640 }
 0x421   : > { %vm877_vm0 = vcmp.ge.f32.partialorder %v1204_v46, %v641_v21  ;;  %v1002_v46 = vmax.f32 %v2136_v52, 1e-37 }
 0x422   : > { %vm2107_vm11 = vmand %vm877_vm0, %vm869_vm8 }
 0x423   : > { %v2439_v4 = vsel %vm2107_vm11, 4294967295, %v2438_v4 }
 0x427   : > { %v644_v33 = vpop.xlane.xlu1 %643 }
 0x428   : > { %vm878_vm3 = vcmp.ge.f32.partialorder %v1205_v57, %v644_v33  ;;  %v1003_v57 = vmax.f32 %v1201_v47, 1e-37 }
 0x429   : > { %v647_v44 = vpop.xlane.xlu0 %646  ;;  %vm2116_vm7 = vmand %vm878_vm3, %vm870_vm6  ;;  %vm2347_vm6 = vcmp.gt.f32.partialorder %v2103_v0, 0.05 }
 0x42a   : > { %vm879_vm4 = vcmp.ge.f32.partialorder %v1206_v6, %v647_v44 }
 0x42b   : > { %v650_v3 = vpop.xlane.xlu1 %649  ;;  %vm2123_vm8 = vmand %vm879_vm4, %vm871_vm15  ;;  %vm898_vm4 = vcmp.ge.f32.partialorder %v2066_v55, %v2063_v41 }
 0x42c   : > { %vm880_vm2 = vcmp.ge.f32.partialorder %v1207_v63, %v650_v3  ;;  %vm2161_vm15 = vmand %vm897_vm13, %vm2347_vm6  ;;  %v1203_v63 = vpop.eup %1202 }
 0x42d   : > { %v653_v58 = vpop.xlane.xlu0 %652  ;;  %vm2155_vm14 = vmand %vm880_vm2, %vm872_vm12  ;;  %v2449_v17 = vsel %vm2161_vm15, 4294967295, %v2448_v17  ;;  %vm2450_vm12 = vcmp.eq.s32.totalorder %v2113_v1, 1  ;;  %v1004_v39 = vmax.f32 %v1203_v63, 1e-37 }
 0x42e   : > { %vm881_vm0 = vcmp.ge.f32.partialorder %v2056_v18, %v653_v58  ;;  %vm2451_vm13 = vmand %vm2116_vm7, %vm2093_vm9  ;;  %vm2458_vm7 = vcmask 523264  }
 0x42f   : > { %v656_v37 = vpop.xlane.xlu1 %655  ;;  %vm2183_vm11 = vmand %vm881_vm0, %vm2452_vm10  ;;  %vm899_vm0 = vcmp.ge.f32.partialorder %v2077_v29, %v2063_v41  ;;  %vm2463_vm10 = vnez %v2433_v53 }
 0x430   : > { %v2454_v28 = vsel %vm2183_vm11, 4294967295, %v2453_v28 }
 0x431   : > { %v659_v9 = vpop.xlane.xlu0 %658 }
 0x433   : > { %v948_v38 = vpop.permute.xlu1 %947 }
 0x434   : > { %vm968_vm3 = vcmp.eq.s32.totalorder %v948_v38, 1 }
 0x435   : > { %vm982_vm2 = vmand %vm968_vm3, %vm2450_vm12  ;;  %vm2455_vm3 = vcmp.gt.f32.partialorder %v2136_v52, 0.05 }
 0x436   : > { %vm990_vm6 = vmand %vm2451_vm13, %vm982_vm2 }
 0x437   : > { %v1006_v61 = vsel %vm990_vm6, %v998_v56, 0.0  ;;  %v951_v20 = vpop.permute.xlu1 %950  ;;  %vm2189_vm9 = vmand %vm898_vm4, %vm2455_vm3 }
 0x438   : > { %v2457_v12 = vsel %vm2189_vm9, 4294967295, %v2456_v12  ;;  %1014 = vst.msk [vmem:[%s2193_s13 + $0x8] sm:$0xff] %vm2458_vm7, %v1006_v61  ;;  %vm969_vm6 = vcmp.eq.s32.totalorder %v951_v20, 1  ;;  %vm2459_vm4 = vmand %vm2123_vm8, %vm2099_vm5  ;;  %vm882_vm5 = vcmp.ge.f32.partialorder %v2066_v55, %v656_v37  ;;  %vm2465_vm8 = vcmp.gt.f32.partialorder %v1201_v47, 0.05 }
 0x439   : > { %vm983_vm2 = vmand %vm969_vm6, %vm2450_vm12  ;;  %v945_v35 = vpop.permute.xlu0 %944  ;;  %vm2461_vm6 = vcmask 523264  }
 0x43a   : > { %vm991_vm13 = vmand %vm2459_vm4, %vm983_vm2  ;;  %vm967_vm3 = vcmp.eq.s32.totalorder %v945_v35, 1 }
 0x43b   : > { %v1007_v2 = vsel %vm991_vm13, %v999_v8, 0.0  ;;  %vm2460_vm7 = vmmov %vm2450_vm12  ;;  %v954_v45 = vpop.permute.xlu1 %953  ;;  %vm2462_vm12 = vnez %v2439_v4 }
 0x43c   : > { %vm981_vm15 = vmand %vm967_vm3, %vm2460_vm7  ;;  %1015 = vst.msk [vmem:[%s2193_s13 + $0x10] sm:$0xff] %vm2461_vm6, %v1007_v2  ;;  %vm970_vm1 = vcmp.eq.s32.totalorder %v954_v45, 1 }
 0x43d   : > { %vm2464_vm9 = vmand %vm2462_vm12, %vm2463_vm10 }
 0x43e   : > { %vm989_vm11 = vmand %vm2464_vm9, %vm981_vm15  ;;  %vm2472_vm9 = vnez %v2449_v17 }
 0x43f   : > { %vm2219_vm2 = vmand %vm899_vm0, %vm2465_vm8  ;;  %v1005_v30 = vsel %vm989_vm11, %v997_v25, 0.0  ;;  %v957_v49 = vpop.permute.xlu1 %956  ;;  %vm2474_vm11 = vcmp.gt.f32.partialorder %v2136_v52, 0.05  ;;  %vm883_vm8 = vcmp.ge.f32.partialorder %v2077_v29, %v659_v9 }
 0x440   : > { %vm2468_vm4 = vmmov %vm2460_vm7  ;;  %vm2470_vm7 = vnez %v2445_v19 }
 0x441   : > { %vm984_vm13 = vmand %vm970_vm1, %vm2468_vm4 }
 0x442   : > { %vm2469_vm3 = vmmov %vm2461_vm6  ;;  %vm2473_vm6 = vnez %v2454_v28 }
 0x443   : > { %1013 = vst.msk [vmem:[%s2193_s13] sm:$0xff] %vm2469_vm3, %v1005_v30  ;;  %vm2471_vm10 = vmand %vm2155_vm14, %vm2470_vm7  ;;  %vm971_vm14 = vcmp.eq.s32.totalorder %v957_v49, 1  ;;  %vm2478_vm7 = vnez %v2457_v12  ;;  %v960_v36 = vpop.permute.xlu1 %959 }
 0x444   : > { %vm992_vm15 = vmand %vm2471_vm10, %vm984_vm13 }
 0x445   : > { %vm913_vm0 = vmand %vm2473_vm6, %vm2472_vm9  ;;  %v1008_v11 = vsel %vm992_vm15, %v1000_v43, 0.0  ;;  %vm972_vm6 = vcmp.eq.s32.totalorder %v960_v36, 1 }
 0x446   : > { %vm2239_vm1 = vmand %vm882_vm5, %vm2474_vm11  ;;  %vm2479_vm5 = vcmp.gt.f32.partialorder %v1201_v47, 0.05 }
 0x447   : > { %vm2477_vm12 = vmmov %vm2469_vm3  ;;  %v963_v5 = vpop.permute.xlu1 %962 }
 0x448   : > { %1016 = vst.msk [vmem:[%s2193_s13 + $0x18] sm:$0xff] %vm2477_vm12, %v1008_v11  ;;  %vm985_vm13 = vmand %vm971_vm14, %vm2468_vm4 }
 0x449   : > { %vm993_vm3 = vmand %vm913_vm0, %vm985_vm13 }
 0x44a   : > { %vm914_vm10 = vmand %vm2239_vm1, %vm2478_vm7  ;;  %v1009_v34 = vsel %vm993_vm3, %v1001_v31, 0.0 }
 0x44b   : > { %vm891_vm15 = vmand %vm883_vm8, %vm2479_vm5  ;;  %vm900_vm5 = vcmp.ge.f32.partialorder %v1211_v7, %v2063_v41 }
 0x44c   : > { %vm2480_vm9 = vmmov %vm2477_vm12 }
 0x44d   : > { %1017 = vst.msk [vmem:[%s2193_s13 + $0x20] sm:$0xff] %vm2480_vm9, %v1009_v34  ;;  %vm2481_vm11 = vmmov %vm2468_vm4  ;;  %vm973_vm4 = vcmp.eq.s32.totalorder %v963_v5, 1 }
 0x44e   : > { %vm986_vm12 = vmand %vm972_vm6, %vm2481_vm11 }
 0x44f   : > { %vm994_vm0 = vmand %vm914_vm10, %vm986_vm12  ;;  %vm876_vm10 = vcmp.gt.f32.partialorder %v1203_v63, 0.05 }
 0x450   : > { %v1010_v16 = vsel %vm994_vm0, %v1002_v46, 0.0  ;;  %vm915_vm1 = vmand %vm891_vm15, %vm2219_vm2 }
 0x451   : > { %vm2482_vm14 = vmmov %vm2480_vm9 }
 0x452   : > { %1018 = vst.msk [vmem:[%s2193_s13 + $0x28] sm:$0xff] %vm2482_vm14, %v1010_v16  ;;  %vm2483_vm13 = vmmov %vm2481_vm11 }
 0x453   : > { %vm987_vm8 = vmand %vm973_vm4, %vm2483_vm13 }
 0x454   : > { %vm995_vm3 = vmand %vm915_vm1, %vm987_vm8 }
 0x455   : > { %v1011_v6 = vsel %vm995_vm3, %v1003_v57, 0.0  ;;  %vm2484_vm7 = vmmov %vm2480_vm9 }
 0x456   : > { %1019 = vst.msk [vmem:[%s2193_s13 + $0x30] sm:$0xff] %vm2484_vm7, %v1011_v6  ;;  %vm908_vm15 = vmand %vm900_vm5, %vm876_vm10 }
 0x457   : > { %vm2485_vm12 = vmmov %vm2483_vm13 }
 0x458   : > { %vm2486_vm14 = vmmov %vm2484_vm7 }
 0x478   : > { %v662_v59 = vpop.xlane.xlu1 %661 }
 0x479   : > { %vm884_vm2 = vcmp.ge.f32.partialorder %v1211_v7, %v662_v59 }
 0x47a   : > { %vm892_vm9 = vmand %vm884_vm2, %vm876_vm10 }
 0x47b   : > { %vm916_vm6 = vmand %vm892_vm9, %vm908_vm15 }
 0x47c   : > { %v966_v18 = vpop.permute.xlu1 %965 }
 0x47d   : > { %vm974_vm11 = vcmp.eq.s32.totalorder %v966_v18, 1 }
 0x47e   : > { %vm988_vm0 = vmand %vm974_vm11, %vm2485_vm12 }
 0x47f   : > { %vm996_vm1 = vmand %vm916_vm6, %vm988_vm0 }
 0x480   : > { %v1012_v22 = vsel %vm996_vm1, %v1004_v39, 0.0 }
 0x481   : > { %1020 = vst.msk [vmem:[%s2193_s13 + $0x38] sm:$0xff] %vm2486_vm14, %v1012_v22 }
 0x482   : > { %1225 = shalt.err (!%p1222_p3)
}
 0x483   : > { %s1226_s5 = scalar_lea.hbm %s2275_s26, 1024  ;;  %s1230_s8 = scalar_lea.hbm %s2328_s4, 2048 }
 0x484   : > { %p1227_p4 = scmp.ne.s32.totalorder %s2275_s26, %s1226_s5  ;;  %p1231_p9 = scmp.lt.u32.totalorder %s2275_s26, %s2328_s4 }
 0x485   : > { %p1232_p10 = scmp.lt.u32.totalorder %s1230_s8, %s1226_s5  ;;  %p1234_p12 = scmp.lt.u32.totalorder %s1226_s5, %s2275_s26 }
 0x486   : > { %p1228_p7 = pnand %p1227_p4, %p1343_p5 }
 0x487   : > { %p1233_p11 = por %p1232_p10, %p1231_p9 }
 0x488   : > { %p1229_p8 = pneg %p1228_p7 }
 0x489   : > { %p1235_p13 = por %p1234_p12, %p1233_p11 }
 0x48b   : > { %p1236_p0 = pnand %p1235_p13, %p1229_p8 }
 0x48d   : > { %1239 = shalt.err (!%p1236_p0)
}
 0x48e   : > { %s1278_s11 = smov 128   ;;  %s1279_s12 = smov 8  }
 0x48f   : > { %1144 = dma.vmem_to_hbm [thread:$0]  (%p1343_p5), %s2277_s19, 1024, %s2275_s26, %s2283_s3, %s1278_s11, %s1278_s11, %s1279_s12  }
 0x490 PF: > { %p1150_p1 = scmp.ge.s32.totalorder %s1274_s18, 2  ;;  %s1050_s13 = sand.u32 1, %s1262_s15  }
 0x491   : > { %s1051_s14 = scalar_lea.sflag [#allocation3], %s1050_s13 }
 0x492   : > { %p1147_p2 = pnand %p1150_p1, %p1347_p6 }
 0x494   : > { %1257 = dma.done.wait (!%p1147_p2), %s1051_s14, 1024  }
 0x495   : > { %1259 = vsyncadd (!%p1147_p2), %s1051_s14, 4294966272  ;;  %p14_p3 = scmp.ge.s32.totalorder %s1330_s20, 4   ;;  %s2487_s15 = smov %s1266_s16 }
 0x496   : > { %s2488_s16 = smov %s1270_s17  ;;  %s2489_s17 = smov %s1341_s23 }
 0x497   : > { %s2490_s18 = smov %s1330_s20  ;;  %16 = sbr.rel (!%p14_p3) target bundleno = 3 (0x3), region = 80 }
 0x49e   :  { %1056 = vsyncpa [#allocation3], 1 }
 0x49f   :  { %1058 = vsyncpa [#allocation3 + $0x1], 1 }

</bundles_post_ra>
